<compile_context>
chip_gen: v7x
topology: tpu7x:2x2x1
jax: 0.10.0
libtpu: 0.0.40
codegen_flags: <defaults>
</compile_context>

<pallas_src>
import functools

import jax
import jax.numpy as jnp
from jax.experimental import pallas as pl
from jax.experimental.pallas import tpu as pltpu

FEAT_C = 1536   # EfficientNet-B3 feature channels
ATT_C = 1       # attention_conv out channels
RED_C = 100     # channel_reduction out channels
M_PAD = 128     # stacked weight rows: 0..99 = w_red, 100 = w_att, 101..127 = 0


def _head_kernel(f_ref, w_ref, b_ref, out_ref, att_ref):
    """One (Bt, channels, spatial-tile) block.

    f_ref:   (Bt, 1536, TC) bf16/f32 feature tile
    w_ref:   (128, 1536)    combined weights (rows 0..99 = w_red, 100 = w_att)
    b_ref:   (128, 1) f32   combined biases  (rows 0..99 = b_red, 100 = b_att)
    out_ref: (Bt, 100, TC)  f32   channel_reduction output
    att_ref: (Bt, 1,   TC)  f32   attention map
    """
    bt = f_ref.shape[0]
    for bi in range(bt):                       # static unroll over batch block
        f = f_ref[bi]                                         # (C, TC)
        # Single MXU matmul for both 1x1 convs, f32 accumulation.
        y = jnp.dot(w_ref[...], f, preferred_element_type=jnp.float32)  # (128, TC)

        logits = y[RED_C:RED_C + 1] + b_ref[RED_C:RED_C + 1]  # (1, TC)
        att = jax.nn.sigmoid(logits)                          # (1, TC) f32
        att_ref[bi] = att.astype(att_ref.dtype)

        # Fused scaling: (W_red @ f) * (1 + att) + b_red, all in f32.
        out = y[:RED_C] * (1.0 + att) + b_ref[:RED_C]         # (100, TC)
        out_ref[bi] = out.astype(out_ref.dtype)


@functools.partial(jax.jit, static_argnames=("tile_cols", "batch_block"))
def feature_encoder_head(features_nchw, w_att, b_att, w_red, b_red, *,
                         tile_cols=1024, batch_block=None):
    """features_nchw: (B, 1536, H, W) backbone feature map (bf16 or f32).

    Weights in PyTorch Conv2d layout with the 1x1 taps squeezed:
      w_att: (1, 1536)   b_att: (1, 1)   w_red: (100, 1536)   b_red: (100, 1)

    Returns (out, attention_map): (B, 100, H, W) f32 and (B, 1, H, W) f32,
    matching the PyTorch module's NCHW convention.
    """
    B, C, H, W = features_nchw.shape
    assert C == FEAT_C
    HW = H * W
    f = features_nchw.reshape(B, C, HW)

    # Spatial (lane) tile.  If the whole map fits in one tile, use the full
    # extent (always a legal block, no padding, no extra HBM pass).  Otherwise
    # use a 128-multiple tile; the ragged tail (if any) is handled by Pallas'
    # edge masking and the column-independent math.
    if HW <= tile_cols:
        tc = HW
    else:
        tc = max(128, (tile_cols // 128) * 128)
    n_tiles = pl.cdiv(HW, tc)

    # Batch block: amortize per-grid-step overhead for tiny spatial maps while
    # keeping >= 2 grid steps so v7x's two TensorCores both get work.
    bt = batch_block
    if bt is None:
        bt = 1
        if n_tiles == 1:
            for cand in (8, 4, 2):
                if B % cand == 0 and (B // cand) * n_tiles >= 2:
                    bt = cand
                    break

    # Stack the attention row onto the reduction weights, zero-pad to 128 rows
    # so the single matmul's M dim is sublane/MXU aligned.
    wdt = f.dtype
    w_comb = jnp.zeros((M_PAD, C), wdt)
    w_comb = w_comb.at[:RED_C].set(w_red.astype(wdt))
    w_comb = w_comb.at[RED_C].set(w_att[0].astype(wdt))
    b_comb = jnp.zeros((M_PAD, 1), jnp.float32)
    b_comb = b_comb.at[:RED_C].set(b_red.astype(jnp.float32))
    b_comb = b_comb.at[RED_C].set(b_att[0].astype(jnp.float32))

    grid = (pl.cdiv(B, bt), n_tiles)

    # VMEM budget: double-buffered feature/output blocks + resident weights.
    itemsize = jnp.dtype(wdt).itemsize
    feat_block = bt * C * tc * itemsize
    out_block = bt * (RED_C + ATT_C) * tc * 4
    weight_bytes = M_PAD * C * itemsize + M_PAD * 4
    vmem_limit = min(100 * 1024 * 1024,
                     max(32 * 1024 * 1024,
                         2 * feat_block + 2 * out_block + weight_bytes
                         + 4 * 1024 * 1024))

    cost = pl.CostEstimate(
        flops=2 * M_PAD * C * B * HW,
        transcendentals=B * HW,
        bytes_accessed=(B * C * HW * itemsize
                        + B * (RED_C + ATT_C) * HW * 4
                        + weight_bytes),
    )

    out, att = pl.pallas_call(
        _head_kernel,
        out_shape=(
            jax.ShapeDtypeStruct((B, RED_C, HW), jnp.float32),
            jax.ShapeDtypeStruct((B, ATT_C, HW), jnp.float32),
        ),
        grid=grid,
        in_specs=[
            pl.BlockSpec((bt, C, tc), lambda i, j: (i, 0, j)),     # feature tile
            pl.BlockSpec(memory_space=pltpu.MemorySpace.VMEM),     # w_comb (128,C)
            pl.BlockSpec(memory_space=pltpu.MemorySpace.VMEM),     # b_comb (128,1)
        ],
        out_specs=(
            pl.BlockSpec((bt, RED_C, tc), lambda i, j: (i, 0, j)),
            pl.BlockSpec((bt, ATT_C, tc), lambda i, j: (i, 0, j)),
        ),
        compiler_params=pltpu.CompilerParams(
            dimension_semantics=("parallel", "parallel"),
            vmem_limit_bytes=int(vmem_limit)),
        cost_estimate=cost,
    )(f, w_comb, b_comb)

    return out.reshape(B, RED_C, H, W), att.reshape(B, ATT_C, H, W)


def init_params(key, dtype=jnp.bfloat16):
    """Deterministic init of the two 1x1 convs in (Cout, Cin) matmul layout."""
    k1, k2, k3, k4 = jax.random.split(key, 4)
    scale = 1.0 / jnp.sqrt(jnp.float32(FEAT_C))
    w_att = (jax.random.normal(k1, (ATT_C, FEAT_C), jnp.float32) * scale).astype(dtype)
    b_att = jax.random.normal(k2, (1, 1), jnp.float32) * 0.01
    w_red = (jax.random.normal(k3, (RED_C, FEAT_C), jnp.float32) * scale).astype(dtype)
    b_red = jax.random.normal(k4, (RED_C, 1), jnp.float32) * 0.01
    return w_att, b_att, w_red, b_red


if __name__ == "__main__":
    key = jax.random.PRNGKey(0)
    k_feat, k_param = jax.random.split(key)

    # Small synthetic EfficientNet-B3 feature map: (B=2, C=1536, H=8, W=8).
    # Backbone output is taken in bf16 (halves the HBM traffic into the head).
    B, H, W = 2, 8, 8
    features = jax.random.normal(
        k_feat, (B, FEAT_C, H, W), jnp.float32).astype(jnp.bfloat16)
    w_att, b_att, w_red, b_red = init_params(k_param)

    out, att = feature_encoder_head(features, w_att, b_att, w_red, b_red)
    jax.block_until_ready((out, att))

    assert out.shape == (B, RED_C, H, W), out.shape
    assert att.shape == (B, ATT_C, H, W), att.shape

    # Pure-JAX f32 reference of the head (same bf16-rounded inputs).
    f32 = features.astype(jnp.float32).reshape(B, FEAT_C, H * W)
    wa32 = w_att.astype(jnp.float32)
    wr32 = w_red.astype(jnp.float32)
    att_ref = jax.nn.sigmoid(
        jnp.einsum("oc,bcn->bon", wa32, f32) + b_att.reshape(1, ATT_C, 1))
    out_ref = (jnp.einsum("oc,bcn->bon", wr32, f32 * (1.0 + att_ref))
               + b_red.reshape(1, RED_C, 1))
    att_ref = att_ref.reshape(B, ATT_C, H, W)
    out_ref = out_ref.reshape(B, RED_C, H, W)

    assert jnp.allclose(att, att_ref, atol=2e-2, rtol=2e-2), \
        float(jnp.max(jnp.abs(att - att_ref)))
    assert jnp.allclose(out, out_ref, atol=5e-2, rtol=5e-2), \
        float(jnp.max(jnp.abs(out - out_ref)))

    print("KERNEL_OK")
</pallas_src>

<mosaic_0001>
module attributes {stable_mosaic.version = 11 : i64} {
  func.func @_head_kernel(%arg0: i32, %arg1: i32, %arg2: memref<1x1536x64xbf16, #tpu.memory_space<vmem>>, %arg3: memref<128x1536xbf16, #tpu.memory_space<vmem>>, %arg4: memref<128x1xf32, #tpu.memory_space<vmem>>, %arg5: memref<1x100x64xf32, #tpu.memory_space<vmem>>, %arg6: memref<1x1x64xf32, #tpu.memory_space<vmem>>) attributes {dimension_semantics = [#tpu.dimension_semantics<parallel>, #tpu.dimension_semantics<parallel>], iteration_bounds = array<i64: 2, 1>, scalar_prefetch = 0 : i64, scratch_operands = 0 : i64, tpu.core_type = #tpu.core_type<tc>, window_params = [{transform_indices = @transform_0, window_bounds = array<i64: 1, 1536, 64>}, {pipeline_mode = #tpu.pipeline_mode<synchronous>, transform_indices = @transform_1, window_bounds = array<i64: 128, 1536>}, {pipeline_mode = #tpu.pipeline_mode<synchronous>, transform_indices = @transform_2, window_bounds = array<i64: 128, 1>}, {transform_indices = @transform_3, window_bounds = array<i64: 1, 100, 64>}, {transform_indices = @transform_4, window_bounds = array<i64: 1, 1, 64>}]} {
    %c0 = arith.constant 0 : index
    %c0_0 = arith.constant 0 : index
    %c0_1 = arith.constant 0 : index
    %0 = vector.load %arg2[%c0, %c0_0, %c0_1] : memref<1x1536x64xbf16, #tpu.memory_space<vmem>>, vector<1x1536x64xbf16>
    %1 = vector.shape_cast %0 : vector<1x1536x64xbf16> to vector<1536x64xbf16>
    %c0_2 = arith.constant 0 : index
    %c0_3 = arith.constant 0 : index
    %2 = vector.load %arg3[%c0_2, %c0_3] : memref<128x1536xbf16, #tpu.memory_space<vmem>>, vector<128x1536xbf16>
    %cst = arith.constant dense<0.000000e+00> : vector<128x64xf32>
    %3 = tpu.matmul %2, %1, %cst {dimension_numbers = #tpu.dot_dimension_numbers<[1], [0], [0], [1], [0, 0, 1, 1], [], []>} : vector<128x1536xbf16>, vector<1536x64xbf16>, vector<128x64xf32> -> vector<128x64xf32>
    %4 = vector.extract_strided_slice %3 {offsets = [100, 0], sizes = [1, 64], strides = [1, 1]} : vector<128x64xf32> to vector<1x64xf32>
    %c100 = arith.constant 100 : index
    %c0_4 = arith.constant 0 : index
    %5 = vector.load %arg4[%c100, %c0_4] : memref<128x1xf32, #tpu.memory_space<vmem>>, vector<1x1xf32>
    %6 = vector.broadcast %5 : vector<1x1xf32> to vector<1x64xf32>
    %7 = arith.addf %4, %6 : vector<1x64xf32>
    %8 = arith.negf %7 : vector<1x64xf32>
    %9 = math.exp %8 : vector<1x64xf32>
    %cst_5 = arith.constant 1.000000e+00 : f32
    %10 = vector.broadcast %cst_5 : f32 to vector<1x64xf32>
    %11 = arith.addf %10, %9 : vector<1x64xf32>
    %12 = arith.divf %10, %11 : vector<1x64xf32>
    %c0_6 = arith.constant 0 : index
    %c0_7 = arith.constant 0 : index
    %c0_8 = arith.constant 0 : index
    %13 = vector.load %arg6[%c0_6, %c0_7, %c0_8] : memref<1x1x64xf32, #tpu.memory_space<vmem>>, vector<1x1x64xf32>
    %14 = vector.shape_cast %13 : vector<1x1x64xf32> to vector<1x64xf32>
    %15 = vector.shape_cast %12 : vector<1x64xf32> to vector<1x1x64xf32>
    tpu.vector_store %arg6[%c0_6, %c0_7, %c0_8], %15 {strides = array<i32>} : memref<1x1x64xf32, #tpu.memory_space<vmem>>, vector<1x1x64xf32>,
    %16 = vector.extract_strided_slice %3 {offsets = [0, 0], sizes = [100, 64], strides = [1, 1]} : vector<128x64xf32> to vector<100x64xf32>
    %cst_9 = arith.constant 1.000000e+00 : f32
    %17 = vector.broadcast %cst_9 : f32 to vector<1x64xf32>
    %18 = arith.addf %17, %12 : vector<1x64xf32>
    %19 = vector.broadcast %18 : vector<1x64xf32> to vector<100x64xf32>
    %20 = arith.mulf %16, %19 : vector<100x64xf32>
    %c0_10 = arith.constant 0 : index
    %c0_11 = arith.constant 0 : index
    %21 = vector.load %arg4[%c0_10, %c0_11] : memref<128x1xf32, #tpu.memory_space<vmem>>, vector<100x1xf32>
    %22 = vector.broadcast %21 : vector<100x1xf32> to vector<100x64xf32>
    %23 = arith.addf %20, %22 : vector<100x64xf32>
    %c0_12 = arith.constant 0 : index
    %c0_13 = arith.constant 0 : index
    %c0_14 = arith.constant 0 : index
    %24 = vector.load %arg5[%c0_12, %c0_13, %c0_14] : memref<1x100x64xf32, #tpu.memory_space<vmem>>, vector<1x100x64xf32>
    %25 = vector.shape_cast %24 : vector<1x100x64xf32> to vector<100x64xf32>
    %26 = vector.shape_cast %23 : vector<100x64xf32> to vector<1x100x64xf32>
    tpu.vector_store %arg5[%c0_12, %c0_13, %c0_14], %26 {strides = array<i32>} : memref<1x100x64xf32, #tpu.memory_space<vmem>>, vector<1x100x64xf32>,
    return
  }
  func.func @transform_0(%arg0: i32, %arg1: i32) -> (i32, i32, i32) {
    %c0_i32 = arith.constant 0 : i32
    %c0_i32_0 = arith.constant 0 : i32
    return %arg0, %c0_i32, %arg1 : i32, i32, i32
  }
  func.func @transform_1(%arg0: i32, %arg1: i32) -> (i32, i32) {
    %c0_i32 = arith.constant 0 : i32
    %c0_i32_0 = arith.constant 0 : i32
    %c0_i32_1 = arith.constant 0 : i32
    return %c0_i32, %c0_i32_0 : i32, i32
  }
  func.func @transform_2(%arg0: i32, %arg1: i32) -> (i32, i32) {
    %c0_i32 = arith.constant 0 : i32
    %c0_i32_0 = arith.constant 0 : i32
    %c0_i32_1 = arith.constant 0 : i32
    return %c0_i32, %c0_i32_0 : i32, i32
  }
  func.func @transform_3(%arg0: i32, %arg1: i32) -> (i32, i32, i32) {
    %c0_i32 = arith.constant 0 : i32
    %c0_i32_0 = arith.constant 0 : i32
    return %arg0, %c0_i32, %arg1 : i32, i32, i32
  }
  func.func @transform_4(%arg0: i32, %arg1: i32) -> (i32, i32, i32) {
    %c0_i32 = arith.constant 0 : i32
    %c0_i32_0 = arith.constant 0 : i32
    return %arg0, %c0_i32, %arg1 : i32, i32, i32
  }
}

</mosaic_0001>

<bundles_post_ra>
// kernel: feature_encoder_head.1
= control target key start
LH: loop header
LB: loop body
LE: loop exit
PB: predicated region body
PF: predicated region fallthrough
CT: control target
= control target key end

     0   :  { %s3322_s15 = smov 0   ;;  %s3324_s16 = smov 0   ;;  %s3936_s0 = inlined_call_operand.vmem [shape: bf16[2,1536,64], index: 0, kind: input, shape index: {}]   ;;  %s3937_s1 = inlined_call_operand.vmem [shape: bf16[128,1536], index: 1, kind: input, shape index: {}]   ;;  %s3938_s2 = inlined_call_operand.vmem [shape: f32[128,1], index: 2, kind: input, shape index: {}]   ;;  %s3939_s3 = inlined_call_operand.vmem [shape: f32[2,100,64], index: 3, kind: output, shape index: {0}]   ;;  %s3940_s4 = inlined_call_operand.vmem [shape: f32[2,1,64], index: 4, kind: output, shape index: {1}]  }
   0x1   :  { %s3326_s17 = smov 0  }
   0x2 LB: > { %s27_s18 = sadd.s32 1, %s3290_s16  ;;  %p2417_p0 = scmp.ge.s32.totalorder %s3294_s17, 1  ;;  %s3294_s17 = sphi %s3326_s17, %s15_s17   ;;  %s3290_s16 = sphi %s3324_s16, %s3942_s16   ;;  %s3286_s15 = sphi %s3322_s15, %s3941_s15  }
   0x3   : > { %p29_p1 = scmp.ge.s32.totalorder %s27_s18, 2  ;;  %p186_p2 = scmp.lt.s32.totalorder %s3294_s17, 3 }
   0x5   : > { %s3944_s18 = smov (%p29_p1, %s27_s18), 0  ;;  %p187_p3 = pnand %p2417_p0, %p186_p2 }
   0x6   : > { %p224_p4 = scmp.lt.s32.totalorder (!%p187_p3), %s3286_s15, 1  ;;  %v3062_v0 = vld [vmem:[%s3937_s1 + $0x4] ss:$48 sps:$4 sm:$0xff] (!%p187_p3)   ;;  %v3065_v1 = vld [vmem:[%s3937_s1 + $0xc] ss:$48 sps:$4 sm:$0xff] (!%p187_p3)   ;;  %vm2169_vm0 = vcmask (!%p187_p3), 520196  }
   0x7   : > { %190 = sbr.rel (%p187_p3) target bundleno = 490 (0x1ea), region = 32  ;;  %1623 = vmatprep.mubr.bf16.mxu0 (!%p187_p3), %v3062_v0  ;;  %1717 = vmatprep.mubr.bf16.mxu1 (!%p187_p3), %v3065_v1  ;;  %v3060_v32 = vld [vmem:[%s3937_s1] ss:$48 sps:$4 sm:$0xff] (!%p187_p3)   ;;  %v3063_v34 = vld [vmem:[%s3937_s1 + $0x8] ss:$48 sps:$4 sm:$0xff] (!%p187_p3)   ;;  %vm2280_vm1 = vcmask (!%p187_p3), 523264  }
   0x8   : > { %v3070_v36 = vld [vmem:[%s3937_s1 + $0x64] ss:$48 sps:$4 sm:$0xff] (!%p187_p3)   ;;  %v3072_v38 = vld [vmem:[%s3937_s1 + $0x6c] ss:$48 sps:$4 sm:$0xff] (!%p187_p3)   ;;  %v3074_v43 = vld [vmem:[%s3937_s1 + $0x60] ss:$48 sps:$4 sm:$0xff] (!%p187_p3)  }
   0x9   : > { %v3075_v47 = vld [vmem:[%s3937_s1 + $0x68] ss:$48 sps:$4 sm:$0xff] (!%p187_p3)   ;;  %v3080_v48 = vld [vmem:[%s3937_s1 + $0xc4] ss:$48 sps:$4 sm:$0xff] (!%p187_p3)   ;;  %v3082_v49 = vld [vmem:[%s3937_s1 + $0xcc] ss:$48 sps:$4 sm:$0xff] (!%p187_p3)  }
   0xa   : > { %v3084_v54 = vld [vmem:[%s3937_s1 + $0xc0] ss:$48 sps:$4 sm:$0xff] (!%p187_p3)   ;;  %v3085_v55 = vld [vmem:[%s3937_s1 + $0xc8] ss:$48 sps:$4 sm:$0xff] (!%p187_p3)   ;;  %v3090_v56 = vld [vmem:[%s3937_s1 + $0x124] ss:$48 sps:$4 sm:$0xff] (!%p187_p3)  }
   0xb   : > { %v3092_v57 = vld [vmem:[%s3937_s1 + $0x12c] ss:$48 sps:$4 sm:$0xff] (!%p187_p3)   ;;  %v3094_v62 = vld [vmem:[%s3937_s1 + $0x120] ss:$48 sps:$4 sm:$0xff] (!%p187_p3)   ;;  %v3095_v63 = vld [vmem:[%s3937_s1 + $0x128] ss:$48 sps:$4 sm:$0xff] (!%p187_p3)  }
   0xc   : > { %v3100_v0 = vld [vmem:[%s3937_s1 + $0x184] ss:$48 sps:$4 sm:$0xff] (!%p187_p3)   ;;  %v3102_v1 = vld [vmem:[%s3937_s1 + $0x18c] ss:$48 sps:$4 sm:$0xff] (!%p187_p3)   ;;  %vm2293_vm2 = vcmask (!%p187_p3), 519168  }
   0xe   : > { %s3946_s15 = smov (!%p224_p4, %s3286_s15), 1 }
   0xf   : > { %s2999_s23 = smul.u32 768, %s3946_s15  ;;  %s245_s30 = scalar_lea.vmem %s3940_s4, %s3946_s15 }
  0x10   : > { %s3000_s5 = smul.u32 104, %s3946_s15 }
  0x11   : > { %s3352_s26 = scalar_lea.vmem %s3936_s0, %s2999_s23 }
  0x12   : > { %v3028_v2 = vld [vmem:[%s3352_s26 + $0x40] sm:$0xff]   ;;  %v3032_v6 = vld [vmem:[%s3352_s26 + $0x48] sm:$0xff]   ;;  %v3036_v10 = vld [vmem:[%s3352_s26 + $0x50] sm:$0xff]   ;;  %s3891_s7 = scalar_lea.vmem %s3939_s3, %s3000_s5 }
  0x13   : > { %v3029_v3 = vld [vmem:[%s3352_s26 + $0xc0] sm:$0xff]   ;;  %2615 = vmatprep.subr.bf16.mxu0 %v3028_v2  ;;  %v3033_v7 = vld [vmem:[%s3352_s26 + $0xc8] sm:$0xff]   ;;  %v3037_v11 = vld [vmem:[%s3352_s26 + $0xd0] sm:$0xff]  }
  0x14   : > { %v3030_v4 = vld [vmem:[%s3352_s26] sm:$0xff]   ;;  %2679 = vmatprep.subr.bf16.mxu1 %v3029_v3  ;;  %v3034_v8 = vld [vmem:[%s3352_s26 + $0x8] sm:$0xff]   ;;  %v3038_v12 = vld [vmem:[%s3352_s26 + $0x10] sm:$0xff]  }
  0x15   : > { %v3031_v5 = vld [vmem:[%s3352_s26 + $0x80] sm:$0xff]   ;;  %2616 = vmatpush3.bf16.msra.mxu0 %v3030_v4  ;;  %v3035_v9 = vld [vmem:[%s3352_s26 + $0x88] sm:$0xff]   ;;  %v3039_v13 = vld [vmem:[%s3352_s26 + $0x90] sm:$0xff]  }
  0x16   : > { %2680 = vmatpush3.bf16.msra.mxu1 %v3031_v5  ;;  %2617 = vmatprep.subr.bf16.mxu0 %v3032_v6  ;;  %v3040_v14 = vld [vmem:[%s3352_s26 + $0x58] sm:$0xff]   ;;  %v3044_v18 = vld [vmem:[%s3352_s26 + $0x60] sm:$0xff]   ;;  %v3048_v22 = vld [vmem:[%s3352_s26 + $0x68] sm:$0xff]  }
  0x17   : > { %2681 = vmatprep.subr.bf16.mxu1 %v3033_v7  ;;  %v3041_v15 = vld [vmem:[%s3352_s26 + $0xd8] sm:$0xff]   ;;  %v3045_v19 = vld [vmem:[%s3352_s26 + $0xe0] sm:$0xff]   ;;  %v3049_v23 = vld [vmem:[%s3352_s26 + $0xe8] sm:$0xff]  }
  0x18   : > { %v3042_v16 = vld [vmem:[%s3352_s26 + $0x18] sm:$0xff]   ;;  %v3046_v20 = vld [vmem:[%s3352_s26 + $0x20] sm:$0xff]   ;;  %v3050_v24 = vld [vmem:[%s3352_s26 + $0x28] sm:$0xff]  }
  0x19   : > { %2618 = vmatpush3.bf16.msra.mxu0 %v3034_v8  ;;  %v3043_v17 = vld [vmem:[%s3352_s26 + $0x98] sm:$0xff]   ;;  %v3047_v21 = vld [vmem:[%s3352_s26 + $0xa0] sm:$0xff]   ;;  %v3051_v25 = vld [vmem:[%s3352_s26 + $0xa8] sm:$0xff]  }
  0x1a   : > { %2682 = vmatpush3.bf16.msra.mxu1 %v3035_v9  ;;  %2619 = vmatprep.subr.bf16.mxu0 %v3036_v10  ;;  %v3052_v26 = vld [vmem:[%s3352_s26 + $0x70] sm:$0xff]   ;;  %v3056_v30 = vld [vmem:[%s3352_s26 + $0x78] sm:$0xff]   ;;  %v3066_v37 = vld [vmem:[%s3352_s26 + $0x140] sm:$0xff]  }
  0x1b   : > { %2683 = vmatprep.subr.bf16.mxu1 %v3037_v11  ;;  %v3053_v27 = vld [vmem:[%s3352_s26 + $0xf0] sm:$0xff]   ;;  %v3057_v31 = vld [vmem:[%s3352_s26 + $0xf8] sm:$0xff]   ;;  %v3067_v39 = vld [vmem:[%s3352_s26 + $0x100] sm:$0xff]  }
  0x1c   : > { %v3054_v28 = vld [vmem:[%s3352_s26 + $0x30] sm:$0xff]   ;;  %v3058_v33 = vld [vmem:[%s3352_s26 + $0x38] sm:$0xff]   ;;  %v3068_v40 = vld [vmem:[%s3352_s26 + $0x1c0] sm:$0xff]  }
  0x1d   : > { %2620 = vmatpush3.bf16.msra.mxu0 %v3038_v12  ;;  %v3055_v29 = vld [vmem:[%s3352_s26 + $0xb0] sm:$0xff]   ;;  %v3059_v35 = vld [vmem:[%s3352_s26 + $0xb8] sm:$0xff]   ;;  %v3069_v41 = vld [vmem:[%s3352_s26 + $0x180] sm:$0xff]  }
  0x1e   : > { %2684 = vmatpush3.bf16.msra.mxu1 %v3039_v13  ;;  %2621 = vmatprep.subr.bf16.mxu0 %v3040_v14  ;;  %v3076_v42 = vld [vmem:[%s3352_s26 + $0x148] sm:$0xff]   ;;  %v3086_v50 = vld [vmem:[%s3352_s26 + $0x150] sm:$0xff]   ;;  %v3096_v58 = vld [vmem:[%s3352_s26 + $0x158] sm:$0xff]  }
  0x1f   : > { %2685 = vmatprep.subr.bf16.mxu1 %v3041_v15  ;;  %v3077_v44 = vld [vmem:[%s3352_s26 + $0x108] sm:$0xff]   ;;  %v3087_v51 = vld [vmem:[%s3352_s26 + $0x110] sm:$0xff]   ;;  %v3097_v59 = vld [vmem:[%s3352_s26 + $0x118] sm:$0xff]  }
  0x20   : > { %v3078_v45 = vld [vmem:[%s3352_s26 + $0x1c8] sm:$0xff]   ;;  %v3088_v52 = vld [vmem:[%s3352_s26 + $0x1d0] sm:$0xff]   ;;  %v3098_v60 = vld [vmem:[%s3352_s26 + $0x1d8] sm:$0xff]  }
  0x21   : > { %2622 = vmatpush3.bf16.msra.mxu0 %v3042_v16  ;;  %v3079_v46 = vld [vmem:[%s3352_s26 + $0x188] sm:$0xff]   ;;  %v3089_v53 = vld [vmem:[%s3352_s26 + $0x190] sm:$0xff]   ;;  %v3099_v61 = vld [vmem:[%s3352_s26 + $0x198] sm:$0xff]  }
  0x22   : > { %2686 = vmatpush3.bf16.msra.mxu1 %v3043_v17  ;;  %2623 = vmatprep.subr.bf16.mxu0 %v3044_v18  ;;  %v3106_v2 = vld [vmem:[%s3352_s26 + $0x160] sm:$0xff]   ;;  %v3116_v7 = vld [vmem:[%s3352_s26 + $0x168] sm:$0xff]   ;;  %v3126_v14 = vld [vmem:[%s3352_s26 + $0x170] sm:$0xff]  }
  0x23   : > { %2687 = vmatprep.subr.bf16.mxu1 %v3045_v19  ;;  %v3107_v3 = vld [vmem:[%s3352_s26 + $0x120] sm:$0xff]   ;;  %v3105_v8 = vld [vmem:[%s3937_s1 + $0x188] ss:$48 sps:$4 sm:$0xff]   ;;  %v3112_v13 = vld [vmem:[%s3937_s1 + $0x1ec] ss:$48 sps:$4 sm:$0xff]  }
  0x24   : > { %v3108_v4 = vld [vmem:[%s3352_s26 + $0x1e0] sm:$0xff]   ;;  %v3117_v10 = vld [vmem:[%s3352_s26 + $0x128] sm:$0xff]   ;;  %v3127_v16 = vld [vmem:[%s3352_s26 + $0x130] sm:$0xff]  }
  0x25   : > { %2624 = vmatpush3.bf16.msra.mxu0 %v3046_v20  ;;  %v3109_v5 = vld [vmem:[%s3352_s26 + $0x1a0] sm:$0xff]   ;;  %v3118_v11 = vld [vmem:[%s3352_s26 + $0x1e8] sm:$0xff]   ;;  %v3128_v18 = vld [vmem:[%s3352_s26 + $0x1f0] sm:$0xff]  }
  0x26   : > { %2688 = vmatpush3.bf16.msra.mxu1 %v3047_v21  ;;  %2625 = vmatprep.subr.bf16.mxu0 %v3048_v22  ;;  %v3104_v6 = vld [vmem:[%s3937_s1 + $0x180] ss:$48 sps:$4 sm:$0xff]   ;;  %v3110_v9 = vld [vmem:[%s3937_s1 + $0x1e4] ss:$48 sps:$4 sm:$0xff]   ;;  %v3119_v12 = vld [vmem:[%s3352_s26 + $0x1a8] sm:$0xff]  }
  0x27   : > { %2689 = vmatprep.subr.bf16.mxu1 %v3049_v23  ;;  %v3114_v15 = vld [vmem:[%s3937_s1 + $0x1e0] ss:$48 sps:$4 sm:$0xff]   ;;  %v3115_v17 = vld [vmem:[%s3937_s1 + $0x1e8] ss:$48 sps:$4 sm:$0xff]   ;;  %v3120_v20 = vld [vmem:[%s3937_s1 + $0x244] ss:$48 sps:$4 sm:$0xff]  }
  0x28   : > { %v3129_v19 = vld [vmem:[%s3352_s26 + $0x1b0] sm:$0xff]   ;;  %v3122_v21 = vld [vmem:[%s3937_s1 + $0x24c] ss:$48 sps:$4 sm:$0xff]  }
  0x29   : > { %2626 = vmatpush3.bf16.msra.mxu0 %v3050_v24  ;;  %v3136_v22 = vld [vmem:[%s3352_s26 + $0x178] sm:$0xff]  }
  0x2a   : > { %2690 = vmatpush3.bf16.msra.mxu1 %v3051_v25  ;;  %2627 = vmatprep.subr.bf16.mxu0 %v3052_v26  ;;  %v3137_v23 = vld [vmem:[%s3352_s26 + $0x138] sm:$0xff]   ;;  %v3124_v26 = vld [vmem:[%s3937_s1 + $0x240] ss:$48 sps:$4 sm:$0xff]  }
  0x2b   : > { %2691 = vmatprep.subr.bf16.mxu1 %v3053_v27  ;;  %v3138_v24 = vld [vmem:[%s3352_s26 + $0x1f8] sm:$0xff]  }
  0x2c   : > { %v3139_v25 = vld [vmem:[%s3352_s26 + $0x1b8] sm:$0xff]  }
  0x2d   : > { %2628 = vmatpush3.bf16.msra.mxu0 %v3054_v28  ;;  %v3125_v27 = vld [vmem:[%s3937_s1 + $0x248] ss:$48 sps:$4 sm:$0xff]   ;;  %v3130_v28 = vld [vmem:[%s3937_s1 + $0x2a4] ss:$48 sps:$4 sm:$0xff]  }
  0x2e   : > { %2692 = vmatpush3.bf16.msra.mxu1 %v3055_v29  ;;  %2629 = vmatprep.subr.bf16.mxu0 %v3056_v30  ;;  %v3132_v29 = vld [vmem:[%s3937_s1 + $0x2ac] ss:$48 sps:$4 sm:$0xff]   ;;  %v3146_v30 = vld [vmem:[%s3352_s26 + $0x240] sm:$0xff]  }
  0x2f   : > { %2693 = vmatprep.subr.bf16.mxu1 %v3057_v31  ;;  %v3148_v31 = vld [vmem:[%s3352_s26 + $0x2c0] sm:$0xff]  }
  0x31   : > { %2630 = vmatpush3.bf16.msra.mxu0 %v3058_v33  ;;  %v3135_v33 = vld [vmem:[%s3937_s1 + $0x2a8] ss:$48 sps:$4 sm:$0xff]  }
  0x32   : > { %2694 = vmatpush3.bf16.msra.mxu1 %v3059_v35  ;;  %2743 = vmatprep.subr.bf16.mxu0 %v3066_v37  ;;  %v3145_v35 = vld [vmem:[%s3937_s1 + $0x1c] ss:$48 sps:$4 sm:$0xff]   ;;  %v3143_v37 = vld [vmem:[%s3937_s1 + $0x18] ss:$48 sps:$4 sm:$0xff]  }
  0x33   : > { %2807 = vmatprep.subr.bf16.mxu1 %v3068_v40  ;;  %v3150_v40 = vld [vmem:[%s3937_s1 + $0x74] ss:$48 sps:$4 sm:$0xff]  }
  0x34   : > { %1624 = vmatmul.mubr.bf16.vlgmr.msra.gmra.mrb[0].mxu0 %v3060_v32  ;;  %v3134_v32 = vld [vmem:[%s3937_s1 + $0x2a0] ss:$48 sps:$4 sm:$0xff]  }
  0x35   : > { %1718 = vmatmul.mubr.bf16.vlgmr.msra.gmra.mrb[0].mxu1 %v3063_v34  ;;  %2744 = vmatpush3.bf16.msra.mxu0 %v3067_v39  ;;  %v3142_v34 = vld [vmem:[%s3937_s1 + $0x14] ss:$48 sps:$4 sm:$0xff]  }
  0x36   : > { %1631 = vmatprep.mubr.bf16.mxu0 %v3070_v36  ;;  %2808 = vmatpush3.bf16.msra.mxu1 %v3069_v41  ;;  %v3140_v36 = vld [vmem:[%s3937_s1 + $0x10] ss:$48 sps:$4 sm:$0xff]   ;;  %v3152_v41 = vld [vmem:[%s3937_s1 + $0x7c] ss:$48 sps:$4 sm:$0xff]  }
  0x37   : > { %1725 = vmatprep.mubr.bf16.mxu1 %v3072_v38  ;;  %2745 = vmatprep.subr.bf16.mxu0 %v3076_v42  ;;  %v3147_v38 = vld [vmem:[%s3352_s26 + $0x200] sm:$0xff]   ;;  %v3156_v42 = vld [vmem:[%s3352_s26 + $0x248] sm:$0xff]  }
  0x38   : > { %2809 = vmatprep.subr.bf16.mxu1 %v3078_v45  ;;  %v3149_v39 = vld [vmem:[%s3352_s26 + $0x280] sm:$0xff]   ;;  %v3159_v45 = vld [vmem:[%s3352_s26 + $0x288] sm:$0xff]  }
  0x39   : > { %2746 = vmatpush3.bf16.msra.mxu0 %v3077_v44  ;;  %v3157_v44 = vld [vmem:[%s3352_s26 + $0x208] sm:$0xff]  }
  0x3a   : > { %2810 = vmatpush3.bf16.msra.mxu1 %v3079_v46  ;;  %2747 = vmatprep.subr.bf16.mxu0 %v3086_v50  ;;  %v3154_v46 = vld [vmem:[%s3937_s1 + $0x70] ss:$48 sps:$4 sm:$0xff]  }
  0x3b   : > { %2811 = vmatprep.subr.bf16.mxu1 %v3088_v52  ;;  %v3168_v50 = vld [vmem:[%s3352_s26 + $0x2d0] sm:$0xff]  }
  0x3c   : > { %1632 = vmatmul.mubr.bf16.gmra.mrb[4].mxu0 %v3074_v43  ;;  %v3158_v43 = vld [vmem:[%s3352_s26 + $0x2c8] sm:$0xff]   ;;  %v3167_v52 = vld [vmem:[%s3352_s26 + $0x210] sm:$0xff]  }
  0x3d   : > { %1726 = vmatmul.mubr.bf16.gmra.mrb[4].mxu1 %v3075_v47  ;;  %1639 = vmatprep.mubr.bf16.mxu0 %v3080_v48  ;;  %v3166_v47 = vld [vmem:[%s3352_s26 + $0x250] sm:$0xff]   ;;  %v3155_v48 = vld [vmem:[%s3937_s1 + $0x78] ss:$48 sps:$4 sm:$0xff]  }
  0x3e   : > { %1733 = vmatprep.mubr.bf16.mxu1 %v3082_v49  ;;  %2748 = vmatpush3.bf16.msra.mxu0 %v3087_v51  ;;  %v3160_v49 = vld [vmem:[%s3937_s1 + $0xd4] ss:$48 sps:$4 sm:$0xff]   ;;  %v3162_v51 = vld [vmem:[%s3937_s1 + $0xdc] ss:$48 sps:$4 sm:$0xff]  }
  0x3f   : > { %2812 = vmatpush3.bf16.msra.mxu1 %v3089_v53  ;;  %2749 = vmatprep.subr.bf16.mxu0 %v3096_v58  ;;  %v3169_v53 = vld [vmem:[%s3352_s26 + $0x290] sm:$0xff]   ;;  %v3179_v58 = vld [vmem:[%s3352_s26 + $0x298] sm:$0xff]  }
  0x40   : > { %2813 = vmatprep.subr.bf16.mxu1 %v3098_v60  ;;  %v3186_v60 = vld [vmem:[%s3352_s26 + $0x260] sm:$0xff]  }
  0x42   : > { %2750 = vmatpush3.bf16.msra.mxu0 %v3097_v59  ;;  %v3165_v59 = vld [vmem:[%s3937_s1 + $0xd8] ss:$48 sps:$4 sm:$0xff]  }
  0x43   : > { %2814 = vmatpush3.bf16.msra.mxu1 %v3099_v61  ;;  %2751 = vmatprep.subr.bf16.mxu0 %v3106_v2  ;;  %v3188_v61 = vld [vmem:[%s3352_s26 + $0x2e0] sm:$0xff]   ;;  %v3196_v2 = vld [vmem:[%s3352_s26 + $0x268] sm:$0xff]  }
  0x44   : > { %1640 = vmatmul.mubr.bf16.gmra.mrb[8].mxu0 %v3084_v54  ;;  %2815 = vmatprep.subr.bf16.mxu1 %v3108_v4  ;;  %v3176_v54 = vld [vmem:[%s3352_s26 + $0x258] sm:$0xff]   ;;  %v3198_v4 = vld [vmem:[%s3352_s26 + $0x2e8] sm:$0xff]  }
  0x45   : > { %1734 = vmatmul.mubr.bf16.gmra.mrb[8].mxu1 %v3085_v55  ;;  %1647 = vmatprep.mubr.bf16.mxu0 %v3090_v56  ;;  %v3178_v55 = vld [vmem:[%s3352_s26 + $0x2d8] sm:$0xff]  }
  0x46   : > { %1741 = vmatprep.mubr.bf16.mxu1 %v3092_v57  ;;  %2752 = vmatpush3.bf16.msra.mxu0 %v3107_v3  ;;  %v3177_v56 = vld [vmem:[%s3352_s26 + $0x218] sm:$0xff]   ;;  %v3164_v57 = vld [vmem:[%s3937_s1 + $0xd0] ss:$48 sps:$4 sm:$0xff]   ;;  %v3197_v3 = vld [vmem:[%s3352_s26 + $0x228] sm:$0xff]  }
  0x47   : > { %2816 = vmatpush3.bf16.msra.mxu1 %v3109_v5  ;;  %2753 = vmatprep.subr.bf16.mxu0 %v3116_v7  ;;  %v3199_v5 = vld [vmem:[%s3352_s26 + $0x2a8] sm:$0xff]  }
  0x48   : > { %2817 = vmatprep.subr.bf16.mxu1 %v3118_v11  ;;  %v3175_v7 = vld [vmem:[%s3937_s1 + $0x138] ss:$48 sps:$4 sm:$0xff]   ;;  %v3207_v11 = vld [vmem:[%s3352_s26 + $0x230] sm:$0xff]  }
  0x4a   : > { %2754 = vmatpush3.bf16.msra.mxu0 %v3117_v10  ;;  %v3206_v10 = vld [vmem:[%s3352_s26 + $0x270] sm:$0xff]  }
  0x4b   : > { %2818 = vmatpush3.bf16.msra.mxu1 %v3119_v12  ;;  %2755 = vmatprep.subr.bf16.mxu0 %v3126_v14  ;;  %v3208_v12 = vld [vmem:[%s3352_s26 + $0x2f0] sm:$0xff]  }
  0x4c   : > { %1648 = vmatmul.mubr.bf16.gmra.mrb[12].mxu0 %v3094_v62  ;;  %2819 = vmatprep.subr.bf16.mxu1 %v3128_v18  ;;  %v3170_v62 = vld [vmem:[%s3937_s1 + $0x134] ss:$48 sps:$4 sm:$0xff]   ;;  %v3184_v14 = vld [vmem:[%s3937_s1 + $0x190] ss:$48 sps:$4 sm:$0xff]   ;;  %v3216_v18 = vld [vmem:[%s3352_s26 + $0x278] sm:$0xff]  }
  0x4d   : > { %1742 = vmatmul.mubr.bf16.gmra.mrb[12].mxu1 %v3095_v63  ;;  %1655 = vmatprep.mubr.bf16.mxu0 %v3100_v0  ;;  %v3172_v63 = vld [vmem:[%s3937_s1 + $0x13c] ss:$48 sps:$4 sm:$0xff]   ;;  %v3187_v0 = vld [vmem:[%s3352_s26 + $0x220] sm:$0xff]  }
  0x4e   : > { %1749 = vmatprep.mubr.bf16.mxu1 %v3102_v1  ;;  %2756 = vmatpush3.bf16.msra.mxu0 %v3127_v16  ;;  %v3189_v1 = vld [vmem:[%s3352_s26 + $0x2a0] sm:$0xff]  }
  0x4f   : > { %2820 = vmatpush3.bf16.msra.mxu1 %v3129_v19  ;;  %2757 = vmatprep.subr.bf16.mxu0 %v3136_v22  ;;  %v3190_v16 = vld [vmem:[%s3937_s1 + $0x1f4] ss:$48 sps:$4 sm:$0xff]   ;;  %v3217_v19 = vld [vmem:[%s3352_s26 + $0x238] sm:$0xff]   ;;  %v3194_v22 = vld [vmem:[%s3937_s1 + $0x1f0] ss:$48 sps:$4 sm:$0xff]  }
  0x50   : > { %2821 = vmatprep.subr.bf16.mxu1 %v3138_v24  ;;  %v3200_v24 = vld [vmem:[%s3937_s1 + $0x254] ss:$48 sps:$4 sm:$0xff]  }
  0x52   : > { %2758 = vmatpush3.bf16.msra.mxu0 %v3137_v23  ;;  %v3195_v23 = vld [vmem:[%s3937_s1 + $0x1f8] ss:$48 sps:$4 sm:$0xff]  }
  0x53   : > { %2822 = vmatpush3.bf16.msra.mxu1 %v3139_v25  ;;  %2871 = vmatprep.subr.bf16.mxu0 %v3146_v30  ;;  %v3202_v25 = vld [vmem:[%s3937_s1 + $0x25c] ss:$48 sps:$4 sm:$0xff]   ;;  %v3296_v30 = vmov 0  }
  0x54   : > { %1656 = vmatmul.mubr.bf16.gmra.mrb[16].mxu0 %v3104_v6  ;;  %2935 = vmatprep.subr.bf16.mxu1 %v3148_v31  ;;  %v3174_v6 = vld [vmem:[%s3937_s1 + $0x130] ss:$48 sps:$4 sm:$0xff]  }
  0x55   : > { %1750 = vmatmul.mubr.bf16.gmra.mrb[16].mxu1 %v3105_v8  ;;  %1663 = vmatprep.mubr.bf16.mxu0 %v3110_v9  ;;  %v3180_v8 = vld [vmem:[%s3937_s1 + $0x194] ss:$48 sps:$4 sm:$0xff]   ;;  %v3182_v9 = vld [vmem:[%s3937_s1 + $0x19c] ss:$48 sps:$4 sm:$0xff]   ;;  %v3214_v31 = vld [vmem:[%s3937_s1 + $0x2b0] ss:$48 sps:$4 sm:$0xff]  }
  0x56   : > { %1757 = vmatprep.mubr.bf16.mxu1 %v3112_v13  ;;  %v3209_v13 = vld [vmem:[%s3352_s26 + $0x2b0] sm:$0xff]   ;;  %3026 = vset.pattern.permute.xlu0 %v3296_v30 }
  0x57   : > { %3027 = vset.pattern.permute.xlu1 %v3296_v30 }
  0x5c   : > { %1664 = vmatmul.mubr.bf16.gmra.mrb[20].mxu0 %v3114_v15  ;;  %v3185_v15 = vld [vmem:[%s3937_s1 + $0x198] ss:$48 sps:$4 sm:$0xff]  }
  0x5d   : > { %1758 = vmatmul.mubr.bf16.gmra.mrb[20].mxu1 %v3115_v17  ;;  %1671 = vmatprep.mubr.bf16.mxu0 %v3120_v20  ;;  %v3192_v17 = vld [vmem:[%s3937_s1 + $0x1fc] ss:$48 sps:$4 sm:$0xff]  }
  0x5e   : > { %1765 = vmatprep.mubr.bf16.mxu1 %v3122_v21  ;;  %v3218_v20 = vld [vmem:[%s3352_s26 + $0x2f8] sm:$0xff]  }
  0x5f   : > { %v3219_v21 = vld [vmem:[%s3352_s26 + $0x2b8] sm:$0xff]  }
  0x64   : > { %1672 = vmatmul.mubr.bf16.gmra.mrb[24].mxu0 %v3124_v26  ;;  %v3204_v26 = vld [vmem:[%s3937_s1 + $0x250] ss:$48 sps:$4 sm:$0xff]  }
  0x65   : > { %1766 = vmatmul.mubr.bf16.gmra.mrb[24].mxu1 %v3125_v27  ;;  %1678 = vmatprep.mubr.bf16.mxu0 %v3130_v28  ;;  %v3205_v27 = vld [vmem:[%s3937_s1 + $0x258] ss:$48 sps:$4 sm:$0xff]   ;;  %v3210_v28 = vld [vmem:[%s3937_s1 + $0x2b4] ss:$48 sps:$4 sm:$0xff]  }
  0x66   : > { %1772 = vmatprep.mubr.bf16.mxu1 %v3132_v29  ;;  %v3212_v29 = vld [vmem:[%s3937_s1 + $0x2bc] ss:$48 sps:$4 sm:$0xff]  }
  0x6c   : > { %1679 = vmatmul.mubr.bf16.gmra.mrb[28].mxu0 %v3134_v32  ;;  %v3215_v32 = vld [vmem:[%s3937_s1 + $0x2b8] ss:$48 sps:$4 sm:$0xff]  }
  0x6d   : > { %1773 = vmatmul.mubr.bf16.gmra.mrb[28].mxu1 %v3135_v33  ;;  %1811 = vmatprep.mubr.bf16.mxu0 %v3142_v34  ;;  %v3222_v33 = vld [vmem:[%s3937_s1 + $0x24] ss:$48 sps:$4 sm:$0xff]   ;;  %v3225_v34 = vld [vmem:[%s3937_s1 + $0x2c] ss:$48 sps:$4 sm:$0xff]  }
  0x6e   : > { %1905 = vmatprep.mubr.bf16.mxu1 %v3145_v35  ;;  %v2155_v35 = vld [vmem:[%s3938_s2 + $0x64] sm:$0x1] }
  0x6f   : > { %2158 = vperm.xlu0 %3026, %v2155_v35  }
  0x74   : > { %1812 = vmatmul.mubr.bf16.vlgmr.msra.gmra.mrb[32].mxu0 %v3140_v36  ;;  %v2189_v36 = vld [vmem:[%s3938_s2] sm:$0xff] }
  0x75   : > { %1906 = vmatmul.mubr.bf16.vlgmr.msra.gmra.mrb[32].mxu1 %v3143_v37  ;;  %2872 = vmatpush3.bf16.msra.mxu0 %v3147_v38  ;;  %v3220_v37 = vld [vmem:[%s3937_s1 + $0x20] ss:$48 sps:$4 sm:$0xff]   ;;  %v2192_v38 = vld [vmem:[%s3938_s2 + $0x18] sm:$0xff] }
  0x76   : > { %2936 = vmatpush3.bf16.msra.mxu1 %v3149_v39  ;;  %1819 = vmatprep.mubr.bf16.mxu0 %v3150_v40  ;;  %v3223_v39 = vld [vmem:[%s3937_s1 + $0x28] ss:$48 sps:$4 sm:$0xff]   ;;  %v3226_v40 = vld [vmem:[%s3937_s1 + $0x84] ss:$48 sps:$4 sm:$0xff]  }
  0x77   : > { %1913 = vmatprep.mubr.bf16.mxu1 %v3152_v41  ;;  %2873 = vmatprep.subr.bf16.mxu0 %v3156_v42  ;;  %v2190_v41 = vld [vmem:[%s3938_s2 + $0x8] sm:$0xff] }
  0x78   : > { %2937 = vmatprep.subr.bf16.mxu1 %v3158_v43  ;;  %2204 = vperm.xlu0 %3026, %v2189_v36   ;;  %v3228_v42 = vld [vmem:[%s3937_s1 + $0x8c] ss:$48 sps:$4 sm:$0xff]  }
  0x79   : > { %2874 = vmatpush3.bf16.msra.mxu0 %v3157_v44  ;;  %2209 = vperm.xlu1 %3027, %v2190_v41   ;;  %v2194_v43 = vld [vmem:[%s3938_s2 + $0x28] sm:$0xff]  ;;  %v2191_v44 = vld [vmem:[%s3938_s2 + $0x10] sm:$0xff] }
  0x7a   : > { %2938 = vmatpush3.bf16.msra.mxu1 %v3159_v45  ;;  %2875 = vmatprep.subr.bf16.mxu0 %v3166_v47  ;;  %v3230_v45 = vld [vmem:[%s3937_s1 + $0x80] ss:$48 sps:$4 sm:$0xff]   ;;  %v3231_v47 = vld [vmem:[%s3937_s1 + $0x88] ss:$48 sps:$4 sm:$0xff]  }
  0x7b   : > { %2939 = vmatprep.subr.bf16.mxu1 %v3168_v50  ;;  %v3234_v50 = vld [vmem:[%s3937_s1 + $0xec] ss:$48 sps:$4 sm:$0xff]  }
  0x7c   : > { %1820 = vmatmul.mubr.bf16.gmra.mrb[36].mxu0 %v3154_v46  ;;  %2219 = vperm.xlu0 %3026, %v2192_v38   ;;  %v2196_v46 = vld [vmem:[%s3938_s2 + $0x38] sm:$0xff] }
  0x7d   : > { %1914 = vmatmul.mubr.bf16.gmra.mrb[36].mxu1 %v3155_v48  ;;  %1827 = vmatprep.mubr.bf16.mxu0 %v3160_v49  ;;  %v3232_v48 = vld [vmem:[%s3937_s1 + $0xe4] ss:$48 sps:$4 sm:$0xff]  }
  0x7e   : > { %1921 = vmatprep.mubr.bf16.mxu1 %v3162_v51  ;;  %2876 = vmatpush3.bf16.msra.mxu0 %v3167_v52  ;;  %v2193_v49 = vld [vmem:[%s3938_s2 + $0x20] sm:$0xff]  ;;  %v2198_v51 = vld [vmem:[%s3938_s2 + $0x48] sm:$0xff]  ;;  %v2195_v52 = vld [vmem:[%s3938_s2 + $0x30] sm:$0xff] }
  0x7f   : > { %2940 = vmatpush3.bf16.msra.mxu1 %v3169_v53  ;;  %2877 = vmatprep.subr.bf16.mxu0 %v3176_v54  ;;  %v3236_v53 = vld [vmem:[%s3937_s1 + $0xe0] ss:$48 sps:$4 sm:$0xff]   ;;  %v2200_v54 = vld [vmem:[%s3938_s2 + $0x58] sm:$0xff] }
  0x80   : > { %2941 = vmatprep.subr.bf16.mxu1 %v3178_v55  ;;  %2214 = vperm.xlu1 %3027, %v2191_v44   ;;  %v3237_v55 = vld [vmem:[%s3937_s1 + $0xe8] ss:$48 sps:$4 sm:$0xff]  }
  0x81   : > { %2229 = vperm.xlu0 %3026, %v2194_v43  }
  0x82   : > { %2878 = vmatpush3.bf16.msra.mxu0 %v3177_v56  ;;  %v3238_v56 = vld [vmem:[%s3937_s1 + $0x144] ss:$48 sps:$4 sm:$0xff]  }
  0x83   : > { %2942 = vmatpush3.bf16.msra.mxu1 %v3179_v58  ;;  %2879 = vmatprep.subr.bf16.mxu0 %v3186_v60  ;;  %v3240_v58 = vld [vmem:[%s3937_s1 + $0x14c] ss:$48 sps:$4 sm:$0xff]   ;;  %v3242_v60 = vld [vmem:[%s3937_s1 + $0x140] ss:$48 sps:$4 sm:$0xff]  }
  0x84   : > { %1828 = vmatmul.mubr.bf16.gmra.mrb[40].mxu0 %v3164_v57  ;;  %2943 = vmatprep.subr.bf16.mxu1 %v3188_v61  ;;  %v2197_v57 = vld [vmem:[%s3938_s2 + $0x40] sm:$0xff]  ;;  %v3243_v61 = vld [vmem:[%s3937_s1 + $0x148] ss:$48 sps:$4 sm:$0xff]  }
  0x85   : > { %1922 = vmatmul.mubr.bf16.gmra.mrb[40].mxu1 %v3165_v59  ;;  %1835 = vmatprep.mubr.bf16.mxu0 %v3170_v62  ;;  %v2199_v59 = vld [vmem:[%s3938_s2 + $0x50] sm:$0xff] }
  0x86   : > { %1929 = vmatprep.mubr.bf16.mxu1 %v3172_v63  ;;  %2880 = vmatpush3.bf16.msra.mxu0 %v3187_v0  ;;  %v3244_v62 = vld [vmem:[%s3937_s1 + $0x1a4] ss:$48 sps:$4 sm:$0xff]   ;;  %v2201_v63 = vld [vmem:[%s3938_s2 + $0x60] sm:$0xf]  ;;  %v3246_v0 = vld [vmem:[%s3937_s1 + $0x1ac] ss:$48 sps:$4 sm:$0xff]  }
  0x87   : > { %2944 = vmatpush3.bf16.msra.mxu1 %v3189_v1  ;;  %2881 = vmatprep.subr.bf16.mxu0 %v3196_v2  ;;  %v3248_v1 = vld [vmem:[%s3937_s1 + $0x1a0] ss:$48 sps:$4 sm:$0xff]   ;;  %v3249_v2 = vld [vmem:[%s3937_s1 + $0x1a8] ss:$48 sps:$4 sm:$0xff]  }
  0x88   : > { %2945 = vmatprep.subr.bf16.mxu1 %v3198_v4  ;;  %2224 = vperm.xlu1 %3027, %v2193_v49   ;;  %v3252_v4 = vld [vmem:[%s3937_s1 + $0x20c] ss:$48 sps:$4 sm:$0xff]  }
  0x89   : > { %2239 = vperm.xlu0 %3026, %v2196_v46  }
  0x8a   : > { %2882 = vmatpush3.bf16.msra.mxu0 %v3197_v3  ;;  %v3250_v3 = vld [vmem:[%s3937_s1 + $0x204] ss:$48 sps:$4 sm:$0xff]  }
  0x8b   : > { %2946 = vmatpush3.bf16.msra.mxu1 %v3199_v5  ;;  %2883 = vmatprep.subr.bf16.mxu0 %v3206_v10  ;;  %v3254_v5 = vld [vmem:[%s3937_s1 + $0x200] ss:$48 sps:$4 sm:$0xff]   ;;  %v3261_v10 = vld [vmem:[%s3937_s1 + $0x268] ss:$48 sps:$4 sm:$0xff]  }
  0x8c   : > { %1836 = vmatmul.mubr.bf16.gmra.mrb[44].mxu0 %v3174_v6  ;;  %2947 = vmatprep.subr.bf16.mxu1 %v3208_v12  ;;  %v3255_v6 = vld [vmem:[%s3937_s1 + $0x208] ss:$48 sps:$4 sm:$0xff]   ;;  %v3264_v12 = vld [vmem:[%s3937_s1 + $0x2cc] ss:$48 sps:$4 sm:$0xff]  }
  0x8d   : > { %1930 = vmatmul.mubr.bf16.gmra.mrb[44].mxu1 %v3175_v7  ;;  %1843 = vmatprep.mubr.bf16.mxu0 %v3180_v8  ;;  %v3256_v7 = vld [vmem:[%s3937_s1 + $0x264] ss:$48 sps:$4 sm:$0xff]   ;;  %v3258_v8 = vld [vmem:[%s3937_s1 + $0x26c] ss:$48 sps:$4 sm:$0xff]  }
  0x8e   : > { %1937 = vmatprep.mubr.bf16.mxu1 %v3182_v9  ;;  %2884 = vmatpush3.bf16.msra.mxu0 %v3207_v11  ;;  %v3260_v9 = vld [vmem:[%s3937_s1 + $0x260] ss:$48 sps:$4 sm:$0xff]   ;;  %v3262_v11 = vld [vmem:[%s3937_s1 + $0x2c4] ss:$48 sps:$4 sm:$0xff]  }
  0x8f   : > { %2948 = vmatpush3.bf16.msra.mxu1 %v3209_v13  ;;  %2885 = vmatprep.subr.bf16.mxu0 %v3216_v18  ;;  %v3266_v13 = vld [vmem:[%s3937_s1 + $0x2c0] ss:$48 sps:$4 sm:$0xff]  }
  0x90   : > { %2949 = vmatprep.subr.bf16.mxu1 %v3218_v20  ;;  %2234 = vperm.xlu1 %3027, %v2195_v52  }
  0x91   : > { %2249 = vperm.xlu0 %3026, %v2198_v51  }
  0x92   : > { %2886 = vmatpush3.bf16.msra.mxu0 %v3217_v19 }
  0x93   : > { %2950 = vmatpush3.bf16.msra.mxu1 %v3219_v21 }
  0x94   : > { %1844 = vmatmul.mubr.bf16.gmra.mrb[48].mxu0 %v3184_v14  ;;  %2244 = vperm.xlu1 %3027, %v2197_v57   ;;  %v3267_v14 = vld [vmem:[%s3937_s1 + $0x2c8] ss:$48 sps:$4 sm:$0xff]  }
  0x95   : > { %1938 = vmatmul.mubr.bf16.gmra.mrb[48].mxu1 %v3185_v15  ;;  %1851 = vmatprep.mubr.bf16.mxu0 %v3190_v16 }
  0x96   : > { %1945 = vmatprep.mubr.bf16.mxu1 %v3192_v17  ;;  %2259 = vperm.xlu0 %3026, %v2200_v54  }
  0x98   : > { %2254 = vperm.xlu1 %3027, %v2199_v59  }
  0x9c   : > { %1852 = vmatmul.mubr.bf16.gmra.mrb[52].mxu0 %v3194_v22  ;;  %2264 = vperm.xlu1 %3027, %v2201_v63  }
  0x9d   : > { %1946 = vmatmul.mubr.bf16.gmra.mrb[52].mxu1 %v3195_v23  ;;  %1859 = vmatprep.mubr.bf16.mxu0 %v3200_v24 }
  0x9e   : > { %1953 = vmatprep.mubr.bf16.mxu1 %v3202_v25 }
  0xa4   : > { %1860 = vmatmul.mubr.bf16.gmra.mrb[56].mxu0 %v3204_v26 }
  0xa5   : > { %1954 = vmatmul.mubr.bf16.gmra.mrb[56].mxu1 %v3205_v27  ;;  %1866 = vmatprep.mubr.bf16.mxu0 %v3210_v28 }
  0xa6   : > { %1960 = vmatprep.mubr.bf16.mxu1 %v3212_v29 }
  0xac   : > { %1867 = vmatmul.mubr.bf16.gmra.mrb[60].mxu0 %v3214_v31 }
  0xad   : > { %1961 = vmatmul.mubr.bf16.gmra.mrb[60].mxu1 %v3215_v32  ;;  %1999 = vmatprep.mubr.bf16.mxu0 %v3222_v33 }
  0xae   : > { %2093 = vmatprep.mubr.bf16.mxu1 %v3225_v34 }
  0xb4   : > { %2000 = vmatmul.mubr.bf16.vlgmr.msra.gmra.mrb[64].mxu0 %v3220_v37 }
  0xb5   : > { %2094 = vmatmul.mubr.bf16.vlgmr.msra.gmra.mrb[64].mxu1 %v3223_v39  ;;  %2007 = vmatprep.mubr.bf16.mxu0 %v3226_v40 }
  0xb6   : > { %2101 = vmatprep.mubr.bf16.mxu1 %v3228_v42 }
  0xbc   : > { %2008 = vmatmul.mubr.bf16.gmra.mrb[68].mxu0 %v3230_v45 }
  0xbd   : > { %2102 = vmatmul.mubr.bf16.gmra.mrb[68].mxu1 %v3231_v47  ;;  %2015 = vmatprep.mubr.bf16.mxu0 %v3232_v48 }
  0xbe   : > { %2109 = vmatprep.mubr.bf16.mxu1 %v3234_v50 }
  0xc4   : > { %2016 = vmatmul.mubr.bf16.gmra.mrb[72].mxu0 %v3236_v53 }
  0xc5   : > { %2110 = vmatmul.mubr.bf16.gmra.mrb[72].mxu1 %v3237_v55  ;;  %2023 = vmatprep.mubr.bf16.mxu0 %v3238_v56 }
  0xc6   : > { %2117 = vmatprep.mubr.bf16.mxu1 %v3240_v58 }
  0xcc   : > { %2024 = vmatmul.mubr.bf16.gmra.mrb[76].mxu0 %v3242_v60 }
  0xcd   : > { %2118 = vmatmul.mubr.bf16.gmra.mrb[76].mxu1 %v3243_v61  ;;  %2031 = vmatprep.mubr.bf16.mxu0 %v3244_v62 }
  0xce   : > { %2125 = vmatprep.mubr.bf16.mxu1 %v3246_v0 }
  0xd4   : > { %2032 = vmatmul.mubr.bf16.gmra.mrb[80].mxu0 %v3248_v1 }
  0xd5   : > { %2126 = vmatmul.mubr.bf16.gmra.mrb[80].mxu1 %v3249_v2  ;;  %2039 = vmatprep.mubr.bf16.mxu0 %v3250_v3 }
  0xd6   : > { %2133 = vmatprep.mubr.bf16.mxu1 %v3252_v4 }
  0xdc   : > { %2040 = vmatmul.mubr.bf16.gmra.mrb[84].mxu0 %v3254_v5 }
  0xdd   : > { %2134 = vmatmul.mubr.bf16.gmra.mrb[84].mxu1 %v3255_v6  ;;  %2047 = vmatprep.mubr.bf16.mxu0 %v3256_v7 }
  0xde   : > { %2141 = vmatprep.mubr.bf16.mxu1 %v3258_v8 }
  0xe4   : > { %2048 = vmatmul.mubr.bf16.gmra.mrb[88].mxu0 %v3260_v9 }
  0xe5   : > { %2142 = vmatmul.mubr.bf16.gmra.mrb[88].mxu1 %v3261_v10  ;;  %2054 = vmatprep.mubr.bf16.mxu0 %v3262_v11 }
  0xe6   : > { %2148 = vmatprep.mubr.bf16.mxu1 %v3264_v12 }
  0xec   : > { %2055 = vmatmul.mubr.bf16.gmra.mrb[92].mxu0 %v3266_v13 }
  0xed   : > { %2149 = vmatmul.mubr.bf16.gmra.mrb[92].mxu1 %v3267_v14 }
 0x107   : > { %v2631_v15 = vpop.f32.mrb[0].mxu0 }
 0x108   : > { %v2695_v16 = vpop.f32.mrb[0].mxu1  ;;  %v2632_v17 = vpop.f32.mrb[1].mxu0 }
 0x109   : > { %v2633_v18 = vadd.f32 %v2632_v17, %v2631_v15  ;;  %v2696_v19 = vpop.f32.mrb[1].mxu1  ;;  %v2634_v20 = vpop.f32.mrb[2].mxu0 }
 0x10a   : > { %v2697_v21 = vadd.f32 %v2696_v19, %v2695_v16  ;;  %v2698_v22 = vpop.f32.mrb[2].mxu1  ;;  %v2635_v23 = vpop.f32.mrb[3].mxu0 }
 0x10b   : > { %v2636_v24 = vadd.f32 %v2635_v23, %v2634_v20  ;;  %v2699_v25 = vpop.f32.mrb[3].mxu1 }
 0x10c   : > { %v3774_v26 = vadd.f32 %v2697_v21, %v2633_v18  ;;  %v2700_v27 = vadd.f32 %v2699_v25, %v2698_v22 }
 0x10e   : > { %v3776_v28 = vadd.f32 %v2700_v27, %v2636_v24 }
 0x10f   : > { %v2637_v29 = vpop.f32.mrb[4].mxu0 }
 0x110   : > { %v2701_v30 = vpop.f32.mrb[4].mxu1  ;;  %v2638_v31 = vpop.f32.mrb[5].mxu0 }
 0x111   : > { %v2639_v32 = vadd.f32 %v2638_v31, %v2637_v29  ;;  %v2702_v33 = vpop.f32.mrb[5].mxu1  ;;  %v2640_v34 = vpop.f32.mrb[6].mxu0 }
 0x112   : > { %v2703_v35 = vadd.f32 %v2702_v33, %v2701_v30  ;;  %v2704_v36 = vpop.f32.mrb[6].mxu1  ;;  %v2641_v37 = vpop.f32.mrb[7].mxu0 }
 0x113   : > { %v2642_v38 = vadd.f32 %v2641_v37, %v2640_v34  ;;  %v2705_v39 = vpop.f32.mrb[7].mxu1 }
 0x114   : > { %v3778_v40 = vadd.f32 %v2703_v35, %v2639_v32  ;;  %v2706_v41 = vadd.f32 %v2705_v39, %v2704_v36 }
 0x116   : > { %v3780_v42 = vadd.f32 %v2706_v41, %v2642_v38 }
 0x117   : > { %v2643_v43 = vpop.f32.mrb[8].mxu0 }
 0x118   : > { %v2707_v44 = vpop.f32.mrb[8].mxu1  ;;  %v2644_v45 = vpop.f32.mrb[9].mxu0 }
 0x119   : > { %v2645_v46 = vadd.f32 %v2644_v45, %v2643_v43  ;;  %v2708_v47 = vpop.f32.mrb[9].mxu1  ;;  %v2646_v48 = vpop.f32.mrb[10].mxu0 }
 0x11a   : > { %v2709_v49 = vadd.f32 %v2708_v47, %v2707_v44  ;;  %v2710_v50 = vpop.f32.mrb[10].mxu1  ;;  %v2647_v51 = vpop.f32.mrb[11].mxu0 }
 0x11b   : > { %v2648_v52 = vadd.f32 %v2647_v51, %v2646_v48  ;;  %v2711_v53 = vpop.f32.mrb[11].mxu1 }
 0x11c   : > { %v3782_v54 = vadd.f32 %v2709_v49, %v2645_v46  ;;  %v2712_v55 = vadd.f32 %v2711_v53, %v2710_v50 }
 0x11e   : > { %v3784_v56 = vadd.f32 %v2712_v55, %v2648_v52 }
 0x11f   : > { %v2649_v57 = vpop.f32.mrb[12].mxu0 }
 0x120   : > { %v2713_v58 = vpop.f32.mrb[12].mxu1  ;;  %v2650_v59 = vpop.f32.mrb[13].mxu0 }
 0x121   : > { %v2651_v60 = vadd.f32 %v2650_v59, %v2649_v57  ;;  %v2714_v61 = vpop.f32.mrb[13].mxu1  ;;  %v2652_v62 = vpop.f32.mrb[14].mxu0 }
 0x122   : > { %v2715_v63 = vadd.f32 %v2714_v61, %v2713_v58  ;;  %v2716_v0 = vpop.f32.mrb[14].mxu1  ;;  %v2653_v1 = vpop.f32.mrb[15].mxu0 }
 0x123   : > { %v2654_v2 = vadd.f32 %v2653_v1, %v2652_v62  ;;  %v2717_v3 = vpop.f32.mrb[15].mxu1 }
 0x124   : > { %v3786_v4 = vadd.f32 %v2715_v63, %v2651_v60  ;;  %v2718_v5 = vadd.f32 %v2717_v3, %v2716_v0 }
 0x126   : > { %v3788_v6 = vadd.f32 %v2718_v5, %v2654_v2 }
 0x127   : > { %v2655_v7 = vpop.f32.mrb[16].mxu0 }
 0x128   : > { %v2719_v8 = vpop.f32.mrb[16].mxu1  ;;  %v2656_v9 = vpop.f32.mrb[17].mxu0 }
 0x129   : > { %v2657_v10 = vadd.f32 %v2656_v9, %v2655_v7  ;;  %v2720_v11 = vpop.f32.mrb[17].mxu1  ;;  %v2658_v12 = vpop.f32.mrb[18].mxu0 }
 0x12a   : > { %v2721_v13 = vadd.f32 %v2720_v11, %v2719_v8  ;;  %v2722_v14 = vpop.f32.mrb[18].mxu1  ;;  %v2659_v15 = vpop.f32.mrb[19].mxu0 }
 0x12b   : > { %v2660_v16 = vadd.f32 %v2659_v15, %v2658_v12  ;;  %v2723_v17 = vpop.f32.mrb[19].mxu1 }
 0x12c   : > { %v3790_v18 = vadd.f32 %v2721_v13, %v2657_v10  ;;  %v2724_v19 = vadd.f32 %v2723_v17, %v2722_v14 }
 0x12e   : > { %v3792_v20 = vadd.f32 %v2724_v19, %v2660_v16 }
 0x12f   : > { %v2661_v21 = vpop.f32.mrb[20].mxu0 }
 0x130   : > { %v2725_v22 = vpop.f32.mrb[20].mxu1  ;;  %v2662_v23 = vpop.f32.mrb[21].mxu0 }
 0x131   : > { %v2663_v24 = vadd.f32 %v2662_v23, %v2661_v21  ;;  %v2726_v25 = vpop.f32.mrb[21].mxu1  ;;  %v2664_v27 = vpop.f32.mrb[22].mxu0 }
 0x132   : > { %v2727_v29 = vadd.f32 %v2726_v25, %v2725_v22  ;;  %v2728_v30 = vpop.f32.mrb[22].mxu1  ;;  %v2665_v31 = vpop.f32.mrb[23].mxu0 }
 0x133   : > { %v2666_v32 = vadd.f32 %v2665_v31, %v2664_v27  ;;  %v2729_v33 = vpop.f32.mrb[23].mxu1 }
 0x134   : > { %v3794_v34 = vadd.f32 %v2727_v29, %v2663_v24  ;;  %v2730_v35 = vadd.f32 %v2729_v33, %v2728_v30 }
 0x136   : > { %v3796_v36 = vadd.f32 %v2730_v35, %v2666_v32 }
 0x137   : > { %v2667_v37 = vpop.f32.mrb[24].mxu0 }
 0x138   : > { %v2731_v38 = vpop.f32.mrb[24].mxu1  ;;  %v2668_v39 = vpop.f32.mrb[25].mxu0 }
 0x139   : > { %v2669_v41 = vadd.f32 %v2668_v39, %v2667_v37  ;;  %v2732_v43 = vpop.f32.mrb[25].mxu1  ;;  %v2670_v44 = vpop.f32.mrb[26].mxu0 }
 0x13a   : > { %v2733_v45 = vadd.f32 %v2732_v43, %v2731_v38  ;;  %v2734_v46 = vpop.f32.mrb[26].mxu1  ;;  %v2671_v47 = vpop.f32.mrb[27].mxu0 }
 0x13b   : > { %v2735_v48 = vpop.f32.mrb[27].mxu1 }
 0x13c   : > { %v3798_v49 = vadd.f32 %v2733_v45, %v2669_v41 }
 0x13f   : > { %v2673_v50 = vpop.f32.mrb[28].mxu0 }
 0x140   : > { %v2737_v51 = vpop.f32.mrb[28].mxu1  ;;  %v2674_v52 = vpop.f32.mrb[29].mxu0 }
 0x141   : > { %v2738_v53 = vpop.f32.mrb[29].mxu1  ;;  %v2676_v55 = vpop.f32.mrb[30].mxu0 }
 0x142   : > { %v2740_v57 = vpop.f32.mrb[30].mxu1  ;;  %v2677_v58 = vpop.f32.mrb[31].mxu0 }
 0x143   : > { %v2741_v59 = vpop.f32.mrb[31].mxu1 }
 0x147   : > { %v2759_v60 = vpop.f32.mrb[32].mxu0 }
 0x148   : > { %v2823_v61 = vpop.f32.mrb[32].mxu1  ;;  %v2760_v62 = vpop.f32.mrb[33].mxu0 }
 0x149   : > { %v2761_v63 = vadd.f32 %v2760_v62, %v2759_v60  ;;  %v2824_v0 = vpop.f32.mrb[33].mxu1  ;;  %v2762_v1 = vpop.f32.mrb[34].mxu0 }
 0x14a   : > { %v2825_v2 = vadd.f32 %v2824_v0, %v2823_v61  ;;  %v2826_v3 = vpop.f32.mrb[34].mxu1  ;;  %v2763_v5 = vpop.f32.mrb[35].mxu0 }
 0x14b   : > { %v1814_v7 = vadd.f32 %v2761_v63, %v3774_v26  ;;  %v2764_v8 = vadd.f32 %v2763_v5, %v2762_v1  ;;  %v2827_v9 = vpop.f32.mrb[35].mxu1 }
 0x14c   : > { %v2828_v10 = vadd.f32 %v2827_v9, %v2826_v3 }
 0x14d   : > { %v3801_v11 = vadd.f32 %v2825_v2, %v1814_v7  ;;  %v1817_v12 = vadd.f32 %v2764_v8, %v3776_v28 }
 0x14f   : > { %v3804_v13 = vadd.f32 %v2828_v10, %v1817_v12  ;;  %v2765_v14 = vpop.f32.mrb[36].mxu0 }
 0x150   : > { %v2829_v15 = vpop.f32.mrb[36].mxu1  ;;  %v2766_v16 = vpop.f32.mrb[37].mxu0 }
 0x151   : > { %v2767_v17 = vadd.f32 %v2766_v16, %v2765_v14  ;;  %v2830_v19 = vpop.f32.mrb[37].mxu1  ;;  %v2768_v21 = vpop.f32.mrb[38].mxu0 }
 0x152   : > { %v2831_v22 = vadd.f32 %v2830_v19, %v2829_v15  ;;  %v2832_v23 = vpop.f32.mrb[38].mxu1  ;;  %v2769_v24 = vpop.f32.mrb[39].mxu0 }
 0x153   : > { %v1822_v26 = vadd.f32 %v2767_v17, %v3778_v40  ;;  %v2770_v25 = vadd.f32 %v2769_v24, %v2768_v21  ;;  %v2833_v27 = vpop.f32.mrb[39].mxu1 }
 0x154   : > { %v2834_v29 = vadd.f32 %v2833_v27, %v2832_v23 }
 0x155   : > { %v3807_v30 = vadd.f32 %v2831_v22, %v1822_v26  ;;  %v1825_v28 = vadd.f32 %v2770_v25, %v3780_v42 }
 0x157   : > { %v3810_v31 = vadd.f32 %v2834_v29, %v1825_v28  ;;  %v2771_v32 = vpop.f32.mrb[40].mxu0 }
 0x158   : > { %v2835_v33 = vpop.f32.mrb[40].mxu1  ;;  %v2772_v35 = vpop.f32.mrb[41].mxu0 }
 0x159   : > { %v2773_v37 = vadd.f32 %v2772_v35, %v2771_v32  ;;  %v2836_v38 = vpop.f32.mrb[41].mxu1  ;;  %v2774_v39 = vpop.f32.mrb[42].mxu0 }
 0x15a   : > { %v2837_v41 = vadd.f32 %v2836_v38, %v2835_v33  ;;  %v2838_v43 = vpop.f32.mrb[42].mxu1  ;;  %v2775_v44 = vpop.f32.mrb[43].mxu0 }
 0x15b   : > { %v1830_v40 = vadd.f32 %v2773_v37, %v3782_v54  ;;  %v2776_v45 = vadd.f32 %v2775_v44, %v2774_v39  ;;  %v2839_v46 = vpop.f32.mrb[43].mxu1 }
 0x15c   : > { %v2840_v47 = vadd.f32 %v2839_v46, %v2838_v43 }
 0x15d   : > { %v3813_v48 = vadd.f32 %v2837_v41, %v1830_v40  ;;  %v1833_v42 = vadd.f32 %v2776_v45, %v3784_v56 }
 0x15f   : > { %v3816_v50 = vadd.f32 %v2840_v47, %v1833_v42  ;;  %v2777_v51 = vpop.f32.mrb[44].mxu0 }
 0x160   : > { %v2841_v52 = vpop.f32.mrb[44].mxu1  ;;  %v2778_v53 = vpop.f32.mrb[45].mxu0 }
 0x161   : > { %v2779_v55 = vadd.f32 %v2778_v53, %v2777_v51  ;;  %v2842_v57 = vpop.f32.mrb[45].mxu1  ;;  %v2780_v58 = vpop.f32.mrb[46].mxu0 }
 0x162   : > { %v2843_v59 = vadd.f32 %v2842_v57, %v2841_v52  ;;  %v2844_v60 = vpop.f32.mrb[46].mxu1  ;;  %v2781_v61 = vpop.f32.mrb[47].mxu0 }
 0x163   : > { %v1838_v54 = vadd.f32 %v2779_v55, %v3786_v4  ;;  %v2782_v62 = vadd.f32 %v2781_v61, %v2780_v58  ;;  %v2845_v63 = vpop.f32.mrb[47].mxu1 }
 0x164   : > { %v2846_v0 = vadd.f32 %v2845_v63, %v2844_v60 }
 0x165   : > { %v3819_v1 = vadd.f32 %v2843_v59, %v1838_v54  ;;  %v1841_v56 = vadd.f32 %v2782_v62, %v3788_v6 }
 0x167   : > { %v3822_v2 = vadd.f32 %v2846_v0, %v1841_v56  ;;  %v2783_v3 = vpop.f32.mrb[48].mxu0 }
 0x168   : > { %v2847_v5 = vpop.f32.mrb[48].mxu1  ;;  %v2784_v7 = vpop.f32.mrb[49].mxu0 }
 0x169   : > { %v2785_v8 = vadd.f32 %v2784_v7, %v2783_v3  ;;  %v2848_v9 = vpop.f32.mrb[49].mxu1  ;;  %v2786_v10 = vpop.f32.mrb[50].mxu0 }
 0x16a   : > { %v2849_v12 = vadd.f32 %v2848_v9, %v2847_v5  ;;  %v2850_v14 = vpop.f32.mrb[50].mxu1  ;;  %v2787_v15 = vpop.f32.mrb[51].mxu0 }
 0x16b   : > { %v1846_v4 = vadd.f32 %v2785_v8, %v3790_v18  ;;  %v2788_v16 = vadd.f32 %v2787_v15, %v2786_v10  ;;  %v2851_v17 = vpop.f32.mrb[51].mxu1 }
 0x16c   : > { %v2852_v19 = vadd.f32 %v2851_v17, %v2850_v14 }
 0x16d   : > { %v3825_v21 = vadd.f32 %v2849_v12, %v1846_v4  ;;  %v1849_v6 = vadd.f32 %v2788_v16, %v3792_v20 }
 0x16f   : > { %v3828_v22 = vadd.f32 %v2852_v19, %v1849_v6  ;;  %v2789_v23 = vpop.f32.mrb[52].mxu0 }
 0x170   : > { %v2853_v24 = vpop.f32.mrb[52].mxu1  ;;  %v2790_v26 = vpop.f32.mrb[53].mxu0 }
 0x171   : > { %v2791_v25 = vadd.f32 %v2790_v26, %v2789_v23  ;;  %v2854_v27 = vpop.f32.mrb[53].mxu1  ;;  %v2792_v29 = vpop.f32.mrb[54].mxu0 }
 0x172   : > { %v2855_v28 = vadd.f32 %v2854_v27, %v2853_v24  ;;  %v2856_v32 = vpop.f32.mrb[54].mxu1  ;;  %v2793_v33 = vpop.f32.mrb[55].mxu0 }
 0x173   : > { %v1854_v18 = vadd.f32 %v2791_v25, %v3794_v34  ;;  %v2794_v35 = vadd.f32 %v2793_v33, %v2792_v29  ;;  %v2857_v37 = vpop.f32.mrb[55].mxu1 }
 0x174   : > { %v2858_v38 = vadd.f32 %v2857_v37, %v2856_v32 }
 0x175   : > { %v3831_v39 = vadd.f32 %v2855_v28, %v1854_v18  ;;  %v1857_v20 = vadd.f32 %v2794_v35, %v3796_v36 }
 0x177   : > { %v3834_v41 = vadd.f32 %v2858_v38, %v1857_v20  ;;  %v2795_v43 = vpop.f32.mrb[56].mxu0 }
 0x178   : > { %v2859_v44 = vpop.f32.mrb[56].mxu1  ;;  %v2796_v40 = vpop.f32.mrb[57].mxu0 }
 0x179   : > { %v2797_v45 = vadd.f32 %v2796_v40, %v2795_v43  ;;  %v2860_v46 = vpop.f32.mrb[57].mxu1  ;;  %v2798_v47 = vpop.f32.mrb[58].mxu0 }
 0x17a   : > { %v2861_v42 = vadd.f32 %v2860_v46, %v2859_v44  ;;  %v2862_v51 = vpop.f32.mrb[58].mxu1  ;;  %v2799_v52 = vpop.f32.mrb[59].mxu0 }
 0x17b   : > { %v1862_v34 = vadd.f32 %v2797_v45, %v3798_v49  ;;  %v2863_v53 = vpop.f32.mrb[59].mxu1 }
 0x17d   : > { %v3837_v55 = vadd.f32 %v2861_v42, %v1862_v34 }
 0x17f   : > { %v2801_v57 = vpop.f32.mrb[60].mxu0 }
 0x180   : > { %v2865_v58 = vpop.f32.mrb[60].mxu1  ;;  %v2802_v59 = vpop.f32.mrb[61].mxu0 }
 0x181   : > { %v2866_v36 = vpop.f32.mrb[61].mxu1  ;;  %v2804_v60 = vpop.f32.mrb[62].mxu0 }
 0x182   : > { %v2868_v61 = vpop.f32.mrb[62].mxu1  ;;  %v2805_v54 = vpop.f32.mrb[63].mxu0 }
 0x183   : > { %v2869_v62 = vpop.f32.mrb[63].mxu1 }
 0x187   : > { %v2887_v63 = vpop.f32.mrb[64].mxu0 }
 0x188   : > { %v2951_v0 = vpop.f32.mrb[64].mxu1  ;;  %v2888_v56 = vpop.f32.mrb[65].mxu0 }
 0x189   : > { %v2889_v3 = vadd.f32 %v2888_v56, %v2887_v63  ;;  %v2952_v5 = vpop.f32.mrb[65].mxu1  ;;  %v2890_v7 = vpop.f32.mrb[66].mxu0 }
 0x18a   : > { %v2953_v8 = vadd.f32 %v2952_v5, %v2951_v0  ;;  %v2954_v9 = vpop.f32.mrb[66].mxu1  ;;  %v2891_v49 = vpop.f32.mrb[67].mxu0 }
 0x18b   : > { %v2002_v10 = vadd.f32 %v2889_v3, %v3801_v11  ;;  %v2892_v12 = vadd.f32 %v2891_v49, %v2890_v7  ;;  %v2955_v14 = vpop.f32.mrb[67].mxu1 }
 0x18c   : > { %v2956_v15 = vadd.f32 %v2955_v14, %v2954_v9 }
 0x18d   : > { %v3840_v4 = vadd.f32 %v2953_v8, %v2002_v10  ;;  %v2005_v16 = vadd.f32 %v2892_v12, %v3804_v13 }
 0x18f   : > { %v3843_v17 = vadd.f32 %v2956_v15, %v2005_v16  ;;  %v2893_v19 = vpop.f32.mrb[68].mxu0 }
 0x190   : > { %v2957_v6 = vpop.f32.mrb[68].mxu1  ;;  %v2894_v23 = vpop.f32.mrb[69].mxu0 }
 0x191   : > { %v2895_v24 = vadd.f32 %v2894_v23, %v2893_v19  ;;  %v2958_v26 = vpop.f32.mrb[69].mxu1  ;;  %v2896_v25 = vpop.f32.mrb[70].mxu0 }
 0x192   : > { %v2959_v27 = vadd.f32 %v2958_v26, %v2957_v6  ;;  %v2960_v29 = vpop.f32.mrb[70].mxu1  ;;  %v2897_v28 = vpop.f32.mrb[71].mxu0 }
 0x193   : > { %v2010_v11 = vadd.f32 %v2895_v24, %v3807_v30  ;;  %v2898_v32 = vadd.f32 %v2897_v28, %v2896_v25  ;;  %v2961_v33 = vpop.f32.mrb[71].mxu1 }
 0x194   : > { %v2962_v18 = vadd.f32 %v2961_v33, %v2960_v29 }
 0x195   : > { %v3846_v35 = vadd.f32 %v2959_v27, %v2010_v11  ;;  %v2013_v13 = vadd.f32 %v2898_v32, %v3810_v31 }
 0x197   : > { %v3849_v37 = vadd.f32 %v2962_v18, %v2013_v13  ;;  %v2899_v38 = vpop.f32.mrb[72].mxu0 }
 0x198   : > { %v2963_v20 = vpop.f32.mrb[72].mxu1  ;;  %v2900_v43 = vpop.f32.mrb[73].mxu0 }
 0x199   : > { %v2901_v44 = vadd.f32 %v2900_v43, %v2899_v38  ;;  %v2964_v40 = vpop.f32.mrb[73].mxu1  ;;  %v2902_v45 = vpop.f32.mrb[74].mxu0 }
 0x19a   : > { %v2965_v46 = vadd.f32 %v2964_v40, %v2963_v20  ;;  %v2966_v47 = vpop.f32.mrb[74].mxu1  ;;  %v2903_v42 = vpop.f32.mrb[75].mxu0 }
 0x19b   : > { %v2018_v30 = vadd.f32 %v2901_v44, %v3813_v48  ;;  %v2904_v51 = vadd.f32 %v2903_v42, %v2902_v45  ;;  %v2967_v52 = vpop.f32.mrb[75].mxu1 }
 0x19c   : > { %v2968_v34 = vadd.f32 %v2967_v52, %v2966_v47 }
 0x19d   : > { %v3852_v53 = vadd.f32 %v2965_v46, %v2018_v30  ;;  %v2021_v31 = vadd.f32 %v2904_v51, %v3816_v50  ;;  %v2159_v46 = vpop.permute.xlu0 %2158 }
 0x19f   : > { %v3855_v57 = vadd.f32 %v2968_v34, %v2021_v31  ;;  %v2905_v58 = vpop.f32.mrb[76].mxu0 }
 0x1a0   : > { %v2969_v59 = vpop.f32.mrb[76].mxu1  ;;  %v2906_v36 = vpop.f32.mrb[77].mxu0 }
 0x1a1   : > { %v2907_v60 = vadd.f32 %v2906_v36, %v2905_v58  ;;  %v2970_v61 = vpop.f32.mrb[77].mxu1  ;;  %v2908_v54 = vpop.f32.mrb[78].mxu0 }
 0x1a2   : > { %v2971_v62 = vadd.f32 %v2970_v61, %v2969_v59  ;;  %v2972_v63 = vpop.f32.mrb[78].mxu1  ;;  %v2909_v0 = vpop.f32.mrb[79].mxu0 }
 0x1a3   : > { %v2026_v48 = vadd.f32 %v2907_v60, %v3819_v1  ;;  %v2910_v56 = vadd.f32 %v2909_v0, %v2908_v54  ;;  %v2973_v3 = vpop.f32.mrb[79].mxu1 }
 0x1a4   : > { %v2974_v5 = vadd.f32 %v2973_v3, %v2972_v63 }
 0x1a5   : > { %v3858_v7 = vadd.f32 %v2971_v62, %v2026_v48  ;;  %v2029_v50 = vadd.f32 %v2910_v56, %v3822_v2  ;;  %v2210_v62 = vpop.permute.xlu1 %2209 }
 0x1a7   : > { %v3861_v8 = vadd.f32 %v2974_v5, %v2029_v50  ;;  %v2911_v9 = vpop.f32.mrb[80].mxu0 }
 0x1a8   : > { %v2975_v49 = vpop.f32.mrb[80].mxu1  ;;  %v2912_v10 = vpop.f32.mrb[81].mxu0 }
 0x1a9   : > { %v2913_v12 = vadd.f32 %v2912_v10, %v2911_v9  ;;  %v2976_v14 = vpop.f32.mrb[81].mxu1  ;;  %v2914_v15 = vpop.f32.mrb[82].mxu0 }
 0x1aa   : > { %v2977_v16 = vadd.f32 %v2976_v14, %v2975_v49  ;;  %v2978_v19 = vpop.f32.mrb[82].mxu1  ;;  %v2915_v6 = vpop.f32.mrb[83].mxu0 }
 0x1ab   : > { %v2034_v1 = vadd.f32 %v2913_v12, %v3825_v21  ;;  %v2916_v23 = vadd.f32 %v2915_v6, %v2914_v15  ;;  %v2979_v24 = vpop.f32.mrb[83].mxu1  ;;  %v2205_v10 = vpop.permute.xlu0 %2204 }
 0x1ac   : > { %v2980_v26 = vadd.f32 %v2979_v24, %v2978_v19  ;;  %v2215_v12 = vpop.permute.xlu1 %2214  ;;  %v2172_v19 = vlaneseq }
 0x1ad   : > { %v3864_v25 = vadd.f32 %v2977_v16, %v2034_v1  ;;  %v2037_v2 = vadd.f32 %v2916_v23, %v3828_v22 }
 0x1ae   : > { %v2173_v23 = vshrl.u32 %v2172_v19, 7 }
 0x1af   : > { %v3867_v27 = vadd.f32 %v2980_v26, %v2037_v2  ;;  %v2917_v29 = vpop.f32.mrb[84].mxu0 }
 0x1b0   : > { %v2981_v28 = vpop.f32.mrb[84].mxu1  ;;  %v2918_v11 = vpop.f32.mrb[85].mxu0  ;;  %v2174_v26 = vsub.s32 4, %v2173_v23 }
 0x1b1   : > { %v2919_v32 = vadd.f32 %v2918_v11, %v2917_v29  ;;  %v2982_v33 = vpop.f32.mrb[85].mxu1  ;;  %v2920_v18 = vpop.f32.mrb[86].mxu0 }
 0x1b2   : > { %v2983_v13 = vadd.f32 %v2982_v33, %v2981_v28  ;;  %v2984_v38 = vpop.f32.mrb[86].mxu1  ;;  %v2921_v20 = vpop.f32.mrb[87].mxu0 }
 0x1b3   : > { %v2042_v21 = vadd.f32 %v2919_v32, %v3831_v39  ;;  %v2922_v43 = vadd.f32 %v2921_v20, %v2920_v18  ;;  %v2985_v44 = vpop.f32.mrb[87].mxu1  ;;  %v2160_v39 = vrot.slane %v2159_v46, 4  ;;  %v2225_v15 = vpop.permute.xlu1 %2224 }
 0x1b4   : > { %v2986_v40 = vadd.f32 %v2985_v44, %v2984_v38 }
 0x1b5   : > { %v3870_v45 = vadd.f32 %v2983_v13, %v2042_v21  ;;  %v2045_v22 = vadd.f32 %v2922_v43, %v3834_v41 }
 0x1b7   : > { %v3873_v47 = vadd.f32 %v2986_v40, %v2045_v22  ;;  %v2923_v42 = vpop.f32.mrb[88].mxu0  ;;  %v2235_v1 = vpop.permute.xlu1 %2234 }
 0x1b8   : > { %v2987_v30 = vpop.f32.mrb[88].mxu1  ;;  %v2924_v51 = vpop.f32.mrb[89].mxu0 }
 0x1b9   : > { %v2925_v52 = vadd.f32 %v2924_v51, %v2923_v42  ;;  %v2988_v34 = vpop.f32.mrb[89].mxu1  ;;  %v2926_v31 = vpop.f32.mrb[90].mxu0 }
 0x1ba   : > { %v2989_v58 = vadd.f32 %v2988_v34, %v2987_v30  ;;  %v2990_v59 = vpop.f32.mrb[90].mxu1  ;;  %v2927_v36 = vpop.f32.mrb[91].mxu0 }
 0x1bb   : > { %v2050_v60 = vadd.f32 %v2925_v52, %v3837_v55  ;;  %v2991_v61 = vpop.f32.mrb[91].mxu1  ;;  %v2220_v55 = vpop.permute.xlu0 %2219 }
 0x1bc   : > { %v2245_v2 = vpop.permute.xlu1 %2244 }
 0x1bd   : > { %v3876_v54 = vadd.f32 %v2989_v58, %v2050_v60 }
 0x1bf   : > { %v2162_v41 = vadd.f32 %v2160_v39, %v3876_v54  ;;  %v2929_v63 = vpop.f32.mrb[92].mxu0  ;;  %v2230_v6 = vpop.permute.xlu0 %2229 }
 0x1c0   : > { %v2993_v0 = vpop.f32.mrb[92].mxu1  ;;  %v2930_v48 = vpop.f32.mrb[93].mxu0 }
 0x1c1   : > { %v2612_v56 = vmul.f32 -1.442695, %v2162_v41  ;;  %v2994_v3 = vpop.f32.mrb[93].mxu1  ;;  %v2932_v5 = vpop.f32.mrb[94].mxu0 }
 0x1c2   : > { %v2996_v50 = vpop.f32.mrb[94].mxu1  ;;  %v2933_v9 = vpop.f32.mrb[95].mxu0 }
 0x1c3   : > { %3268 = vpow2.f32 %v2612_v56  ;;  %v2997_v49 = vpop.f32.mrb[95].mxu1  ;;  %v2240_v24 = vpop.permute.xlu0 %2239 }
 0x1c4   : > { %v2255_v20 = vpop.permute.xlu1 %2254 }
 0x1c7   : > { %v2250_v32 = vpop.permute.xlu0 %2249 }
 0x1cd   : > { %v3269_v14 = vpop.eup %3268 }
 0x1ce   : > { %v2166_v16 = vadd.f32 1.0, %v3269_v14 }
 0x1d0   : > { %3270 = vrcp.f32 %v2166_v16 }
 0x1da   : > { %v3271_v29 = vpop.eup %3270 }
 0x1db   : > { %2170 = vst.msk [vmem:[%s245_s30 - $0x4] sm:$0x10] %vm2169_vm0, %v3271_v29  ;;  %v2171_v28 = vadd.f32 1.0, %v3271_v29 }
 0x1dd   : > { %v2175_v11 = vrot.slane %v2171_v28, %v2174_v26 }
 0x1df   : > { %v2176_v33 = vmul.f32 %v2175_v11, %v3840_v4  ;;  %v2177_v18 = vmul.f32 %v2175_v11, %v3843_v17  ;;  %v2178_v13 = vmul.f32 %v2175_v11, %v3846_v35  ;;  %v2179_v38 = vmul.f32 %v2175_v11, %v3849_v37 }
 0x1e0   : > { %v2180_v21 = vmul.f32 %v2175_v11, %v3852_v53  ;;  %v2181_v4 = vmul.f32 %v2175_v11, %v3855_v57  ;;  %v2183_v17 = vmul.f32 %v2175_v11, %v3861_v8  ;;  %v2185_v35 = vmul.f32 %v2175_v11, %v3867_v27 }
 0x1e1   : > { %v2267_v43 = vadd.f32 %v2205_v10, %v2176_v33  ;;  %v2268_v37 = vadd.f32 %v2210_v62, %v2177_v18  ;;  %v2269_v44 = vadd.f32 %v2215_v12, %v2178_v13  ;;  %v2270_v40 = vadd.f32 %v2220_v55, %v2179_v38 }
 0x1e2   : > { %v2271_v22 = vadd.f32 %v2225_v15, %v2180_v21  ;;  %v2272_v46 = vadd.f32 %v2230_v6, %v2181_v4  ;;  %v2274_v42 = vadd.f32 %v2240_v24, %v2183_v17  ;;  %v2276_v30 = vadd.f32 %v2250_v32, %v2185_v35 }
 0x1e3   : > { %2281 = vst.msk [vmem:[%s3891_s7] sm:$0xff] %vm2280_vm1, %v2267_v43  ;;  %2282 = vst.msk [vmem:[%s3891_s7 + $0x8] sm:$0xff] %vm2280_vm1, %v2268_v37  ;;  %v2182_v53 = vmul.f32 %v2175_v11, %v3858_v7  ;;  %v2187_v57 = vmul.f32 %v2175_v11, %v3873_v47  ;;  %v2184_v8 = vmul.f32 %v2175_v11, %v3864_v25  ;;  %v2260_v7 = vpop.permute.xlu0 %2259 }
 0x1e4   : > { %2283 = vst.msk [vmem:[%s3891_s7 + $0x10] sm:$0xff] %vm2280_vm1, %v2269_v44  ;;  %2284 = vst.msk [vmem:[%s3891_s7 + $0x18] sm:$0xff] %vm2280_vm1, %v2270_v40  ;;  %v2186_v27 = vmul.f32 %v2175_v11, %v3870_v45  ;;  %v2188_v47 = vmul.f32 %v2175_v11, %v3876_v54  ;;  %v2265_v45 = vpop.permute.xlu1 %2264 }
 0x1e5   : > { %2285 = vst.msk [vmem:[%s3891_s7 + $0x20] sm:$0xff] %vm2280_vm1, %v2271_v22  ;;  %2286 = vst.msk [vmem:[%s3891_s7 + $0x28] sm:$0xff] %vm2280_vm1, %v2272_v46  ;;  %v2273_v51 = vadd.f32 %v2235_v1, %v2182_v53  ;;  %v2278_v25 = vadd.f32 %v2260_v7, %v2187_v57  ;;  %v2275_v52 = vadd.f32 %v2245_v2, %v2184_v8 }
 0x1e6   : > { %2288 = vst.msk [vmem:[%s3891_s7 + $0x38] sm:$0xff] %vm2280_vm1, %v2274_v42  ;;  %2290 = vst.msk [vmem:[%s3891_s7 + $0x48] sm:$0xff] %vm2280_vm1, %v2276_v30  ;;  %v2277_v34 = vadd.f32 %v2255_v20, %v2186_v27  ;;  %v2279_v31 = vadd.f32 %v2265_v45, %v2188_v47 }
 0x1e7   : > { %2287 = vst.msk [vmem:[%s3891_s7 + $0x30] sm:$0xff] %vm2280_vm1, %v2273_v51  ;;  %2292 = vst.msk [vmem:[%s3891_s7 + $0x58] sm:$0xff] %vm2280_vm1, %v2278_v25 }
 0x1e8   : > { %2289 = vst.msk [vmem:[%s3891_s7 + $0x40] sm:$0xff] %vm2280_vm1, %v2275_v52  ;;  %2291 = vst.msk [vmem:[%s3891_s7 + $0x50] sm:$0xff] %vm2280_vm1, %v2277_v34 }
 0x1e9   : > { %2294 = vst.msk [vmem:[%s3891_s7 + $0x60] sm:$0xf] %vm2293_vm2, %v2279_v31 }
 0x1ea PF: > { %s15_s17 = sadd.s32 1, %s3294_s17   ;;  %s3941_s15 = smov %s3290_s16 }
 0x1eb   : > { %p12_p5 = scmp.ge.s32.totalorder %s15_s17, 4   ;;  %s3942_s16 = smov %s3944_s18 }
 0x1ed   :  { %14 = sbr.rel (!%p12_p5) target bundleno = 2 (0x2), region = 74 }

</bundles_post_ra>
